<compile_context>
chip_gen: v7x
topology: tpu7x:2x2x1
jax: 0.10.0
libtpu: 0.0.40
codegen_flags: <defaults>
</compile_context>

<pallas_src>
import jax
import jax.numpy as jnp
from jax.experimental import pallas as pl
from jax.experimental.pallas import tpu as pltpu

_HIDDEN = 256
_TB_MAX = 512  # batch tile: >=128 lanes for the output, v7x-VMEM safe


def _round_up(x, m):
    return ((x + m - 1) // m) * m


def _td3_critic_kernel(state_ref, action_ref,
                       w1s_ref, w1a_ref, b14_ref,
                       w2_ref, b2_ref, w5_ref, b5_ref,
                       w36_ref, b36_ref,
                       out_ref):
    # ---- fused first layer of both Q heads: (TB, 2*H) in f32 --------------
    h = jnp.dot(state_ref[...], w1s_ref[...], preferred_element_type=jnp.float32)
    h = h + jnp.dot(action_ref[...], w1a_ref[...], preferred_element_type=jnp.float32)
    h = jnp.maximum(h + b14_ref[...], 0.0)

    H = w2_ref.shape[0]
    h1 = h[:, :H].astype(jnp.bfloat16)   # Q1 head hidden (bf16 for MXU)
    h2 = h[:, H:].astype(jnp.bfloat16)   # Q2 head hidden

    # ---- second layers (separate 256x256 matmuls, f32 accumulate) ---------
    g1 = jnp.maximum(
        jnp.dot(h1, w2_ref[...], preferred_element_type=jnp.float32) + b2_ref[...],
        0.0)
    g2 = jnp.maximum(
        jnp.dot(h2, w5_ref[...], preferred_element_type=jnp.float32) + b5_ref[...],
        0.0)

    # ---- final projections: VPU multiply + lane reduction (no N=1 matmul) -
    w3row = w36_ref[0:1, :].astype(jnp.float32)   # (1, H)
    w6row = w36_ref[1:2, :].astype(jnp.float32)   # (1, H)
    q1 = jnp.sum(g1 * w3row, axis=-1) + b36_ref[0]   # (TB,)
    q2 = jnp.sum(g2 * w6row, axis=-1) + b36_ref[1]   # (TB,)

    # Lane-dense combined output: row 0 = q1, row 1 = q2.
    out_ref[0, :] = q1.astype(out_ref.dtype)
    out_ref[1, :] = q2.astype(out_ref.dtype)


def init_params(key, state_dim, action_dim, hidden=_HIDDEN):
    """f32 parameters in [in_features, out_features] layout (x @ W + b)."""
    in_dim = state_dim + action_dim
    shapes = {
        "w1": (in_dim, hidden), "b1": (1, hidden),
        "w2": (hidden, hidden), "b2": (1, hidden),
        "w3": (hidden, 1),      "b3": (1, 1),
        "w4": (in_dim, hidden), "b4": (1, hidden),
        "w5": (hidden, hidden), "b5": (1, hidden),
        "w6": (hidden, 1),      "b6": (1, 1),
    }
    fan_in = {"1": in_dim, "2": hidden, "3": hidden,
              "4": in_dim, "5": hidden, "6": hidden}
    params = {}
    for name, shape in shapes.items():
        key, sub = jax.random.split(key)
        bound = 1.0 / jnp.sqrt(jnp.float32(fan_in[name[1]]))
        params[name] = jax.random.uniform(
            sub, shape, dtype=jnp.float32, minval=-bound, maxval=bound)
    return params


def prepare_kernel_params(params, state_dim):
    """Fuse/split/cast weights once (do this outside the training step)."""
    bf16 = jnp.bfloat16
    w14 = jnp.concatenate([params["w1"], params["w4"]], axis=1)      # (in, 2H)
    b14 = jnp.concatenate([params["b1"], params["b4"]], axis=1)      # (1, 2H)
    w36 = jnp.concatenate([params["w3"].T, params["w6"].T], axis=0)  # (2, H)
    b36 = jnp.concatenate([params["b3"].reshape(-1),
                           params["b6"].reshape(-1)])                # (2,)
    return {
        "w1s": w14[:state_dim].astype(bf16),   # (state_dim, 2H)
        "w1a": w14[state_dim:].astype(bf16),   # (action_dim, 2H)
        "b14": b14.astype(jnp.float32),
        "w2": params["w2"].astype(bf16),
        "b2": params["b2"].astype(jnp.float32),
        "w5": params["w5"].astype(bf16),
        "b5": params["b5"].astype(jnp.float32),
        "w36": w36.astype(bf16),
        "b36": b36.astype(jnp.float32),
    }


def td3_critic_forward(state, action, kp):
    """Equivalent of TD3Critic.forward(state, action) -> (q1, q2)."""
    B, Ds = state.shape
    Da = action.shape[1]
    H = kp["w2"].shape[0]
    H2 = kp["b14"].shape[1]

    TB = min(_TB_MAX, _round_up(B, 128))
    B_pad = _round_up(B, TB)
    grid = (B_pad // TB,)

    s = state.astype(jnp.bfloat16)
    a = action.astype(jnp.bfloat16)
    if B_pad != B:
        pad = B_pad - B
        s = jnp.pad(s, ((0, pad), (0, 0)))
        a = jnp.pad(a, ((0, pad), (0, 0)))

    flops = 2 * B_pad * (Ds * H2 + Da * H2 + 2 * H * H + 2 * H)
    bytes_accessed = (
        s.size * 2 + a.size * 2                                   # bf16 inputs
        + 2 * (kp["w1s"].size + kp["w1a"].size + kp["w2"].size
               + kp["w5"].size + kp["w36"].size)                  # bf16 weights
        + 4 * (kp["b14"].size + kp["b2"].size + kp["b5"].size
               + kp["b36"].size)                                  # f32 biases
        + 4 * 2 * B_pad                                           # f32 output
    )

    out = pl.pallas_call(
        _td3_critic_kernel,
        out_shape=jax.ShapeDtypeStruct((2, B_pad), jnp.float32),
        grid=grid,
        in_specs=[
            pl.BlockSpec((TB, Ds), lambda i: (i, 0)),   # state tile
            pl.BlockSpec((TB, Da), lambda i: (i, 0)),   # action tile
            pl.BlockSpec((Ds, H2), lambda i: (0, 0)),   # w1s (resident)
            pl.BlockSpec((Da, H2), lambda i: (0, 0)),   # w1a
            pl.BlockSpec((1, H2), lambda i: (0, 0)),    # b14
            pl.BlockSpec((H, H), lambda i: (0, 0)),     # w2
            pl.BlockSpec((1, H), lambda i: (0, 0)),     # b2
            pl.BlockSpec((H, H), lambda i: (0, 0)),     # w5
            pl.BlockSpec((1, H), lambda i: (0, 0)),     # b5
            pl.BlockSpec((2, H), lambda i: (0, 0)),     # w36 rows
            pl.BlockSpec(memory_space=pltpu.SMEM),      # b36 scalars
        ],
        out_specs=pl.BlockSpec((2, TB), lambda i: (0, i)),
        compiler_params=pltpu.CompilerParams(
            dimension_semantics=("parallel",)),
        cost_estimate=pl.CostEstimate(
            flops=flops, transcendentals=0, bytes_accessed=bytes_accessed),
    )(s, a, kp["w1s"], kp["w1a"], kp["b14"], kp["w2"], kp["b2"],
      kp["w5"], kp["b5"], kp["w36"], kp["b36"])

    q1 = out[0, :B].reshape(B, 1)
    q2 = out[1, :B].reshape(B, 1)
    return q1, q2


def _reference_forward(state, action, params):
    """Pure-JAX reference mirroring the kernel's bf16 storage rounding."""
    rb = lambda x: x.astype(jnp.bfloat16).astype(jnp.float32)
    sa = jnp.concatenate([rb(state), rb(action)], axis=1)
    h1 = jax.nn.relu(sa @ rb(params["w1"]) + params["b1"])
    h1 = rb(h1)
    h1 = jax.nn.relu(h1 @ rb(params["w2"]) + params["b2"])
    q1 = h1 @ rb(params["w3"]) + params["b3"]
    h2 = jax.nn.relu(sa @ rb(params["w4"]) + params["b4"])
    h2 = rb(h2)
    h2 = jax.nn.relu(h2 @ rb(params["w5"]) + params["b5"])
    q2 = h2 @ rb(params["w6"]) + params["b6"]
    return q1, q2


if __name__ == "__main__":
    key = jax.random.PRNGKey(0)
    state_dim, action_dim, batch = 24, 8, 8

    k_params, k_state, k_action = jax.random.split(key, 3)
    params = init_params(k_params, state_dim, action_dim)
    kparams = prepare_kernel_params(params, state_dim)

    state = jax.random.normal(k_state, (batch, state_dim), dtype=jnp.float32)
    action = jax.random.normal(k_action, (batch, action_dim), dtype=jnp.float32)

    q1, q2 = td3_critic_forward(state, action, kparams)
    jax.block_until_ready((q1, q2))

    r1, r2 = _reference_forward(state, action, params)
    assert q1.shape == (batch, 1) and q2.shape == (batch, 1)
    assert jnp.allclose(q1, r1, atol=5e-3, rtol=5e-3)
    assert jnp.allclose(q2, r2, atol=5e-3, rtol=5e-3)

    print("KERNEL_OK")
</pallas_src>

<mosaic_0001>
module attributes {stable_mosaic.version = 11 : i64} {
  func.func @_td3_critic_kernel(%arg0: i32, %arg1: memref<128x24xbf16, #tpu.memory_space<vmem>>, %arg2: memref<128x8xbf16, #tpu.memory_space<vmem>>, %arg3: memref<24x512xbf16, #tpu.memory_space<vmem>>, %arg4: memref<8x512xbf16, #tpu.memory_space<vmem>>, %arg5: memref<1x512xf32, #tpu.memory_space<vmem>>, %arg6: memref<256x256xbf16, #tpu.memory_space<vmem>>, %arg7: memref<1x256xf32, #tpu.memory_space<vmem>>, %arg8: memref<256x256xbf16, #tpu.memory_space<vmem>>, %arg9: memref<1x256xf32, #tpu.memory_space<vmem>>, %arg10: memref<2x256xbf16, #tpu.memory_space<vmem>>, %arg11: memref<2xf32, #tpu.memory_space<smem>>, %arg12: memref<2x128xf32, #tpu.memory_space<vmem>>) attributes {dimension_semantics = [#tpu.dimension_semantics<parallel>], iteration_bounds = array<i64: 1>, scalar_prefetch = 0 : i64, scratch_operands = 0 : i64, tpu.core_type = #tpu.core_type<tc>, window_params = [{transform_indices = @transform_0, window_bounds = array<i64: 128, 24>}, {transform_indices = @transform_1, window_bounds = array<i64: 128, 8>}, {pipeline_mode = #tpu.pipeline_mode<synchronous>, transform_indices = @transform_2, window_bounds = array<i64: 24, 512>}, {pipeline_mode = #tpu.pipeline_mode<synchronous>, transform_indices = @transform_3, window_bounds = array<i64: 8, 512>}, {pipeline_mode = #tpu.pipeline_mode<synchronous>, transform_indices = @transform_4, window_bounds = array<i64: 1, 512>}, {pipeline_mode = #tpu.pipeline_mode<synchronous>, transform_indices = @transform_5, window_bounds = array<i64: 256, 256>}, {pipeline_mode = #tpu.pipeline_mode<synchronous>, transform_indices = @transform_6, window_bounds = array<i64: 1, 256>}, {pipeline_mode = #tpu.pipeline_mode<synchronous>, transform_indices = @transform_7, window_bounds = array<i64: 256, 256>}, {pipeline_mode = #tpu.pipeline_mode<synchronous>, transform_indices = @transform_8, window_bounds = array<i64: 1, 256>}, {pipeline_mode = #tpu.pipeline_mode<synchronous>, transform_indices = @transform_9, window_bounds = array<i64: 2, 256>}, {transform_indices = @transform_10, window_bounds = array<i64: 2>}, {transform_indices = @transform_11, window_bounds = array<i64: 2, 128>}]} {
    %c0 = arith.constant 0 : index
    %c0_0 = arith.constant 0 : index
    %0 = vector.load %arg1[%c0, %c0_0] : memref<128x24xbf16, #tpu.memory_space<vmem>>, vector<128x24xbf16>
    %c0_1 = arith.constant 0 : index
    %c0_2 = arith.constant 0 : index
    %1 = vector.load %arg3[%c0_1, %c0_2] : memref<24x512xbf16, #tpu.memory_space<vmem>>, vector<24x512xbf16>
    %cst = arith.constant dense<0.000000e+00> : vector<128x512xf32>
    %2 = tpu.matmul %0, %1, %cst {dimension_numbers = #tpu.dot_dimension_numbers<[1], [0], [0], [1], [0, 0, 1, 1], [], []>} : vector<128x24xbf16>, vector<24x512xbf16>, vector<128x512xf32> -> vector<128x512xf32>
    %c0_3 = arith.constant 0 : index
    %c0_4 = arith.constant 0 : index
    %3 = vector.load %arg2[%c0_3, %c0_4] : memref<128x8xbf16, #tpu.memory_space<vmem>>, vector<128x8xbf16>
    %c0_5 = arith.constant 0 : index
    %c0_6 = arith.constant 0 : index
    %4 = vector.load %arg4[%c0_5, %c0_6] : memref<8x512xbf16, #tpu.memory_space<vmem>>, vector<8x512xbf16>
    %cst_7 = arith.constant dense<0.000000e+00> : vector<128x512xf32>
    %5 = tpu.matmul %3, %4, %cst_7 {dimension_numbers = #tpu.dot_dimension_numbers<[1], [0], [0], [1], [0, 0, 1, 1], [], []>} : vector<128x8xbf16>, vector<8x512xbf16>, vector<128x512xf32> -> vector<128x512xf32>
    %6 = arith.addf %2, %5 : vector<128x512xf32>
    %c0_8 = arith.constant 0 : index
    %c0_9 = arith.constant 0 : index
    %7 = vector.load %arg5[%c0_8, %c0_9] : memref<1x512xf32, #tpu.memory_space<vmem>>, vector<1x512xf32>
    %8 = vector.broadcast %7 : vector<1x512xf32> to vector<128x512xf32>
    %9 = arith.addf %6, %8 : vector<128x512xf32>
    %cst_10 = arith.constant 0.000000e+00 : f32
    %10 = vector.broadcast %cst_10 : f32 to vector<128x512xf32>
    %11 = arith.maximumf %9, %10 : vector<128x512xf32>
    %12 = vector.extract_strided_slice %11 {offsets = [0, 0], sizes = [128, 256], strides = [1, 1]} : vector<128x512xf32> to vector<128x256xf32>
    %13 = arith.truncf %12 : vector<128x256xf32> to vector<128x256xbf16>
    %14 = vector.extract_strided_slice %11 {offsets = [0, 256], sizes = [128, 256], strides = [1, 1]} : vector<128x512xf32> to vector<128x256xf32>
    %15 = arith.truncf %14 : vector<128x256xf32> to vector<128x256xbf16>
    %c0_11 = arith.constant 0 : index
    %c0_12 = arith.constant 0 : index
    %16 = vector.load %arg6[%c0_11, %c0_12] : memref<256x256xbf16, #tpu.memory_space<vmem>>, vector<256x256xbf16>
    %cst_13 = arith.constant dense<0.000000e+00> : vector<128x256xf32>
    %17 = tpu.matmul %13, %16, %cst_13 {dimension_numbers = #tpu.dot_dimension_numbers<[1], [0], [0], [1], [0, 0, 1, 1], [], []>} : vector<128x256xbf16>, vector<256x256xbf16>, vector<128x256xf32> -> vector<128x256xf32>
    %c0_14 = arith.constant 0 : index
    %c0_15 = arith.constant 0 : index
    %18 = vector.load %arg7[%c0_14, %c0_15] : memref<1x256xf32, #tpu.memory_space<vmem>>, vector<1x256xf32>
    %19 = vector.broadcast %18 : vector<1x256xf32> to vector<128x256xf32>
    %20 = arith.addf %17, %19 : vector<128x256xf32>
    %cst_16 = arith.constant 0.000000e+00 : f32
    %21 = vector.broadcast %cst_16 : f32 to vector<128x256xf32>
    %22 = arith.maximumf %20, %21 : vector<128x256xf32>
    %c0_17 = arith.constant 0 : index
    %c0_18 = arith.constant 0 : index
    %23 = vector.load %arg8[%c0_17, %c0_18] : memref<256x256xbf16, #tpu.memory_space<vmem>>, vector<256x256xbf16>
    %cst_19 = arith.constant dense<0.000000e+00> : vector<128x256xf32>
    %24 = tpu.matmul %15, %23, %cst_19 {dimension_numbers = #tpu.dot_dimension_numbers<[1], [0], [0], [1], [0, 0, 1, 1], [], []>} : vector<128x256xbf16>, vector<256x256xbf16>, vector<128x256xf32> -> vector<128x256xf32>
    %c0_20 = arith.constant 0 : index
    %c0_21 = arith.constant 0 : index
    %25 = vector.load %arg9[%c0_20, %c0_21] : memref<1x256xf32, #tpu.memory_space<vmem>>, vector<1x256xf32>
    %26 = vector.broadcast %25 : vector<1x256xf32> to vector<128x256xf32>
    %27 = arith.addf %24, %26 : vector<128x256xf32>
    %cst_22 = arith.constant 0.000000e+00 : f32
    %28 = vector.broadcast %cst_22 : f32 to vector<128x256xf32>
    %29 = arith.maximumf %27, %28 : vector<128x256xf32>
    %c0_23 = arith.constant 0 : index
    %c0_24 = arith.constant 0 : index
    %30 = vector.load %arg10[%c0_23, %c0_24] : memref<2x256xbf16, #tpu.memory_space<vmem>>, vector<1x256xbf16>
    %31 = arith.extf %30 : vector<1x256xbf16> to vector<1x256xf32>
    %c1 = arith.constant 1 : index
    %c0_25 = arith.constant 0 : index
    %32 = vector.load %arg10[%c1, %c0_25] : memref<2x256xbf16, #tpu.memory_space<vmem>>, vector<1x256xbf16>
    %33 = arith.extf %32 : vector<1x256xbf16> to vector<1x256xf32>
    %34 = vector.broadcast %31 : vector<1x256xf32> to vector<128x256xf32>
    %35 = arith.mulf %22, %34 : vector<128x256xf32>
    %cst_26 = arith.constant dense<0.000000e+00> : vector<128xf32>
    %36 = vector.multi_reduction <add>, %35, %cst_26 [1] : vector<128x256xf32> to vector<128xf32>
    %c0_27 = arith.constant 0 : index
    %37 = memref.load %arg11[%c0_27] : memref<2xf32, #tpu.memory_space<smem>>
    %38 = vector.broadcast %37 : f32 to vector<128xf32>
    %39 = arith.addf %36, %38 : vector<128xf32>
    %40 = vector.broadcast %33 : vector<1x256xf32> to vector<128x256xf32>
    %41 = arith.mulf %29, %40 : vector<128x256xf32>
    %cst_28 = arith.constant dense<0.000000e+00> : vector<128xf32>
    %42 = vector.multi_reduction <add>, %41, %cst_28 [1] : vector<128x256xf32> to vector<128xf32>
    %c1_29 = arith.constant 1 : index
    %43 = memref.load %arg11[%c1_29] : memref<2xf32, #tpu.memory_space<smem>>
    %44 = vector.broadcast %43 : f32 to vector<128xf32>
    %45 = arith.addf %42, %44 : vector<128xf32>
    %c0_30 = arith.constant 0 : index
    %c0_31 = arith.constant 0 : index
    %46 = vector.load %arg12[%c0_30, %c0_31] : memref<2x128xf32, #tpu.memory_space<vmem>>, vector<1x128xf32>
    %47 = vector.shape_cast %46 : vector<1x128xf32> to vector<128xf32>
    %48 = vector.shape_cast %39 : vector<128xf32> to vector<1x128xf32>
    tpu.vector_store %arg12[%c0_30, %c0_31], %48 {strides = array<i32>} : memref<2x128xf32, #tpu.memory_space<vmem>>, vector<1x128xf32>,
    %c1_32 = arith.constant 1 : index
    %c0_33 = arith.constant 0 : index
    %49 = vector.load %arg12[%c1_32, %c0_33] : memref<2x128xf32, #tpu.memory_space<vmem>>, vector<1x128xf32>
    %50 = vector.shape_cast %49 : vector<1x128xf32> to vector<128xf32>
    %51 = vector.shape_cast %45 : vector<128xf32> to vector<1x128xf32>
    tpu.vector_store %arg12[%c1_32, %c0_33], %51 {strides = array<i32>} : memref<2x128xf32, #tpu.memory_space<vmem>>, vector<1x128xf32>,
    return
  }
  func.func @transform_0(%arg0: i32) -> (i32, i32) {
    %c0_i32 = arith.constant 0 : i32
    %c0_i32_0 = arith.constant 0 : i32
    return %arg0, %c0_i32 : i32, i32
  }
  func.func @transform_1(%arg0: i32) -> (i32, i32) {
    %c0_i32 = arith.constant 0 : i32
    %c0_i32_0 = arith.constant 0 : i32
    return %arg0, %c0_i32 : i32, i32
  }
  func.func @transform_2(%arg0: i32) -> (i32, i32) {
    %c0_i32 = arith.constant 0 : i32
    %c0_i32_0 = arith.constant 0 : i32
    %c0_i32_1 = arith.constant 0 : i32
    return %c0_i32, %c0_i32_0 : i32, i32
  }
  func.func @transform_3(%arg0: i32) -> (i32, i32) {
    %c0_i32 = arith.constant 0 : i32
    %c0_i32_0 = arith.constant 0 : i32
    %c0_i32_1 = arith.constant 0 : i32
    return %c0_i32, %c0_i32_0 : i32, i32
  }
  func.func @transform_4(%arg0: i32) -> (i32, i32) {
    %c0_i32 = arith.constant 0 : i32
    %c0_i32_0 = arith.constant 0 : i32
    %c0_i32_1 = arith.constant 0 : i32
    return %c0_i32, %c0_i32_0 : i32, i32
  }
  func.func @transform_5(%arg0: i32) -> (i32, i32) {
    %c0_i32 = arith.constant 0 : i32
    %c0_i32_0 = arith.constant 0 : i32
    %c0_i32_1 = arith.constant 0 : i32
    return %c0_i32, %c0_i32_0 : i32, i32
  }
  func.func @transform_6(%arg0: i32) -> (i32, i32) {
    %c0_i32 = arith.constant 0 : i32
    %c0_i32_0 = arith.constant 0 : i32
    %c0_i32_1 = arith.constant 0 : i32
    return %c0_i32, %c0_i32_0 : i32, i32
  }
  func.func @transform_7(%arg0: i32) -> (i32, i32) {
    %c0_i32 = arith.constant 0 : i32
    %c0_i32_0 = arith.constant 0 : i32
    %c0_i32_1 = arith.constant 0 : i32
    return %c0_i32, %c0_i32_0 : i32, i32
  }
  func.func @transform_8(%arg0: i32) -> (i32, i32) {
    %c0_i32 = arith.constant 0 : i32
    %c0_i32_0 = arith.constant 0 : i32
    %c0_i32_1 = arith.constant 0 : i32
    return %c0_i32, %c0_i32_0 : i32, i32
  }
  func.func @transform_9(%arg0: i32) -> (i32, i32) {
    %c0_i32 = arith.constant 0 : i32
    %c0_i32_0 = arith.constant 0 : i32
    %c0_i32_1 = arith.constant 0 : i32
    return %c0_i32, %c0_i32_0 : i32, i32
  }
  func.func @transform_10(%arg0: i32) -> i32 {
    %c0_i32 = arith.constant 0 : i32
    %c0_i32_0 = arith.constant 0 : i32
    return %c0_i32 : i32
  }
  func.func @transform_11(%arg0: i32) -> (i32, i32) {
    %c0_i32 = arith.constant 0 : i32
    %c0_i32_0 = arith.constant 0 : i32
    return %c0_i32, %arg0 : i32, i32
  }
}

</mosaic_0001>

<bundles_post_ra>
// kernel: tpu_custom_call.1
= control target key start
LH: loop header
LB: loop body
LE: loop exit
PB: predicated region body
PF: predicated region fallthrough
CT: control target
= control target key end

     0   :  { %16 = vsyncpa [#allocation3], 0  ;;  %s3230_s0 = inlined_call_operand.vmem [shape: bf16[128,24], index: 0, kind: input, shape index: {}]   ;;  %s3231_s1 = inlined_call_operand.vmem [shape: bf16[128,8], index: 1, kind: input, shape index: {}]   ;;  %s3232_s2 = inlined_call_operand.vmem [shape: bf16[24,512], index: 2, kind: input, shape index: {}]   ;;  %s3233_s3 = inlined_call_operand.vmem [shape: bf16[8,512], index: 3, kind: input, shape index: {}]   ;;  %s3234_s4 = inlined_call_operand.vmem [shape: f32[1,512], index: 4, kind: input, shape index: {}]   ;;  %s3235_s5 = inlined_call_operand.hbm [shape: bf16[256,256], index: 5, kind: input, shape index: {}]   ;;  %s3236_s6 = inlined_call_operand.vmem [shape: f32[1,256], index: 6, kind: input, shape index: {}]   ;;  %s3237_s7 = inlined_call_operand.hbm [shape: bf16[256,256], index: 7, kind: input, shape index: {}]   ;;  %s3238_s8 = inlined_call_operand.vmem [shape: f32[1,256], index: 8, kind: input, shape index: {}]   ;;  %s3239_s9 = inlined_call_operand.vmem [shape: bf16[2,256], index: 9, kind: input, shape index: {}]   ;;  %s3240_s10 = inlined_call_operand.vmem [shape: f32[2], index: 10, kind: input, shape index: {}]   ;;  %s3241_s11 = inlined_call_operand.hbm [shape: f32[2,128], index: 11, kind: output, shape index: {}]  }
   0x1   :  { %17 = vsyncpa [#allocation7], 0 }
   0x2   :  { %18 = vsyncpa [#allocation5], 0 }
   0x3   :  { %19 = vsyncpa [#allocation4], 0  ;;  %s2538_s17 = smov [#allocation2]   ;;  %s2452_s21 = scalar_lea.hbm %s3235_s5, 4096 }
   0x4   :  { %s35_s18 = sshll.u32 %s2538_s17, 4  ;;  %p2453_p0 = scmp.ne.s32.totalorder %s3235_s5, %s2452_s21  ;;  %s36_s18 = int_to_ptr.vmem [resolvable:$true] %s35_s18 }
   0x5   :  { %p2456_p1 = scmp.lt.u32.totalorder %s2452_s21, %s3235_s5 }
   0x7   :  { %p2458_p2 = pnand %p2456_p1, %p2453_p0 }
   0x9   :  { %2461 = shalt.err (!%p2458_p2)
}
   0xa   :  { %s2462_s26 = scalar_lea.vmem %s36_s18, 4096  ;;  %p2467_p4 = scmp.lt.s32.totalorder %s36_s18, %s36_s18 }
   0xb   :  { %p2463_p3 = scmp.ne.s32.totalorder %s36_s18, %s2462_s26  ;;  %p2468_p5 = scmp.lt.s32.totalorder %s2462_s26, %s2462_s26 }
   0xd   :  { %p2469_p6 = por %p2468_p5, %p2467_p4 }
   0xf   :  { %p2470_p7 = pnand %p2469_p6, %p2463_p3 }
  0x11   :  { %2473 = shalt.err (!%p2470_p7)
}
  0x12   :  { %s2539_s27 = smov 128   ;;  %s2540_s28 = smov 8  }
  0x13   :  { %41 = dma.hbm_to_vmem [thread:$0]  %s3235_s5, 4096, %s36_s18, [#allocation3], %s2539_s27, %s2539_s27, %s2540_s28  }
  0x14   :  { %s2541_s12 = smov [#allocation6]   ;;  %s66_s16 = sshll.u32 %s3240_s10, 4  ;;  %s67_s16 = int_to_ptr.vmem [resolvable:$true] %s66_s16 }
  0x15   :  { %s49_s13 = sshll.u32 %s2541_s12, 4  ;;  %s2474_s20 = scalar_lea.hbm %s3237_s7, 4096  ;;  %s50_s13 = int_to_ptr.vmem [resolvable:$true] %s49_s13 }
  0x16   :  { %p2475_p8 = scmp.ne.s32.totalorder %s3237_s7, %s2474_s20  ;;  %p2478_p9 = scmp.lt.u32.totalorder %s2474_s20, %s3237_s7 }
  0x18   :  { %p2480_p10 = pnand %p2478_p9, %p2475_p8 }
  0x1a   :  { %2483 = shalt.err (!%p2480_p10)
}
  0x1b   :  { %s2484_s5 = scalar_lea.vmem %s50_s13, 4096  ;;  %p2489_p12 = scmp.lt.s32.totalorder %s50_s13, %s50_s13 }
  0x1c   :  { %p2485_p11 = scmp.ne.s32.totalorder %s50_s13, %s2484_s5  ;;  %p2490_p13 = scmp.lt.s32.totalorder %s2484_s5, %s2484_s5 }
  0x1e   :  { %p2491_p0 = por %p2490_p13, %p2489_p12 }
  0x20   :  { %p2492_p1 = pnand %p2491_p0, %p2485_p11 }
  0x22   :  { %2495 = shalt.err (!%p2492_p1)
}
  0x23   :  { %55 = dma.hbm_to_vmem [thread:$0]  %s3237_s7, 4096, %s50_s13, [#allocation7], %s2539_s27, %s2539_s27, %s2540_s28  }
  0x24   :  { %s2496_s25 = scalar_lea.vmem %s67_s16, 16  ;;  %p2501_p3 = scmp.lt.s32.totalorder %s67_s16, %s67_s16 }
  0x25   :  { %p2497_p2 = scmp.ne.s32.totalorder %s67_s16, %s2496_s25  ;;  %p2502_p4 = scmp.lt.s32.totalorder %s2496_s25, %s2496_s25 }
  0x27   :  { %p2503_p5 = por %p2502_p4, %p2501_p3 }
  0x29   :  { %p2504_p6 = pnand %p2503_p5, %p2497_p2 }
  0x2b   :  { %2507 = shalt.err (!%p2504_p6)
}
  0x2c   :  { %s2542_s26 = smov [#allocation8]  }
  0x2d   :  { %69 = dma.vmem_to_smem %s67_s16, 16, %s2542_s26, [#allocation5]  }
  0x2e   :  { %2530 = dma.done.wait [#allocation3], 4096  }
  0x2f   :  { %2531 = vsyncadd [#allocation3], 4294963200 }
  0x30   :  { %2532 = dma.done.wait [#allocation7], 4096  }
  0x31   :  { %2533 = vsyncadd [#allocation7], 4294963200 }
  0x32   :  { %2534 = dma.done.wait [#allocation5], 16  }
  0x33   :  { %2535 = vsyncadd [#allocation5], 4294967280 }
  0x34   :  { %79 = sfence }
  0x35   :  { %v119_v0 = vld [vmem:[%s3233_s3] sm:$0xff]  ;;  %vm196_vm0 = vcmask 1043456   ;;  %v120_v1 = vld [vmem:[%s3233_s3 + $0x8] sm:$0xff]  ;;  %v2543_v6 = vmov 0   ;;  %vm171_vm1 = vcmask 64512   ;;  %v2338_v23 = vld [vmem:[%s3231_s1 + $0x10] sm:$0xff]  }
  0x36   :  { %v2135_v2 = vcombine.high %v119_v0, %v119_v0  ;;  %v2137_v3 = vcombine.high %v120_v1, %v120_v1  ;;  %v2134_v4 = vcombine.low %v119_v0, %v119_v0  ;;  %v2136_v5 = vcombine.low %v120_v1, %v120_v1  ;;  %241 = vmatprep.mubr.bf16.mxu0 %v2543_v6  ;;  %v2330_v7 = vld [vmem:[%s3231_s1] sm:$0xff]   ;;  %v2334_v12 = vld [vmem:[%s3232_s2 + $0x8] ss:$16 sps:$4 sm:$0xff]   ;;  %v2336_v13 = vld [vmem:[%s3232_s2 + $0xc] ss:$16 sps:$4 sm:$0xff]  }
  0x37   :  { %354 = vmatprep.mubr.bf16.mxu1 %v2543_v6  ;;  %v2331_v8 = vld [vmem:[%s3232_s2] ss:$16 sps:$4 sm:$0xff]   ;;  %v2333_v9 = vld [vmem:[%s3232_s2 + $0x4] ss:$16 sps:$4 sm:$0xff]   ;;  %v102_v15 = vld [vmem:[%s3232_s2 + $0x28] sm:$0xff]  ;;  %vm505_vm2 = vcmask 195584  }
  0x38   :  { %2138 = vmatprep.subr.msk.bf16.mxu0 %vm196_vm0, %v2135_v2  ;;  %2147 = vmatprep.subr.msk.bf16.mxu1 %vm196_vm0, %v2137_v3  ;;  %v198_v10 = vsel %vm196_vm0, %v2134_v4, 0  ;;  %v204_v11 = vsel %vm196_vm0, %v2136_v5, 0  ;;  %v101_v14 = vld [vmem:[%s3232_s2 + $0x20] sm:$0xff]  ;;  %v2171_v17 = vcombine.high %v102_v15, %v102_v15  ;;  %v2170_v19 = vcombine.low %v102_v15, %v102_v15  ;;  %v2337_v20 = vld [vmem:[%s3231_s1 + $0x8] sm:$0xff]   ;;  %v2339_v26 = vld [vmem:[%s3231_s1 + $0x18] sm:$0xff]  }
  0x39   :  { %210 = vmatpush1.bf16.msra.mxu0 %v198_v10  ;;  %323 = vmatpush1.bf16.msra.mxu1 %v204_v11  ;;  %v2169_v16 = vcombine.high %v101_v14, %v101_v14  ;;  %v2168_v18 = vcombine.low %v101_v14, %v101_v14  ;;  %v2358_v24 = vld [vmem:[#allocation2 + $0x4] ss:$8 sps:$4 sm:$0xff]   ;;  %v2346_v29 = vld [vmem:[%s3231_s1 + $0x30] sm:$0xff]   ;;  %v2347_v30 = vld [vmem:[%s3231_s1 + $0x38] sm:$0xff]   ;;  %vm1910_vm3 = vcmask 130112   ;;  %vm1917_vm4 = vcmask 195712  }
  0x3a   :  { %542 = vmatprep.subr.bf16.mxu0 %v2333_v9  ;;  %655 = vmatprep.subr.bf16.mxu1 %v2336_v13  ;;  %v537_v22 = vsel %vm196_vm0, %v2170_v19, 0  ;;  %v2361_v25 = vld [vmem:[#allocation6 + $0x4] ss:$8 sps:$4 sm:$0xff]   ;;  %v2356_v32 = vld [vmem:[#allocation2] ss:$8 sps:$4 sm:$0xff]   ;;  %v2350_v49 = vld [vmem:[%s3230_s0 + $0x10] sm:$0xff]  }
  0x3b   :  { %v531_v21 = vsel %vm196_vm0, %v2168_v18, 0  ;;  %v2340_v27 = vld [vmem:[%s3231_s1 + $0x20] sm:$0xff]   ;;  %v2345_v28 = vld [vmem:[%s3231_s1 + $0x28] sm:$0xff]   ;;  %v2364_v34 = vld [vmem:[#allocation2 + $0x14] ss:$8 sps:$4 sm:$0xff]   ;;  %vm1924_vm5 = vcmask 261312  }
  0x3c   :  { %2139 = vmatmul.mubr.msk.bf16.vlgmr.msra.gmra.mrb[0].mxu0 %vm171_vm1, %v2330_v7  ;;  %2148 = vmatmul.mubr.msk.bf16.vlgmr.msra.gmra.mrb[0].mxu1 %vm171_vm1, %v2330_v7  ;;  %v2348_v31 = vld [vmem:[%s3230_s0] sm:$0xff]   ;;  %v2367_v35 = vld [vmem:[#allocation6 + $0x14] ss:$8 sps:$4 sm:$0xff]   ;;  %v2362_v36 = vld [vmem:[#allocation2 + $0x10] ss:$8 sps:$4 sm:$0xff]   ;;  %vm1931_vm6 = vcmask 326912  }
  0x3d   :  { %543 = vmatpush1.bf16.msra.mxu0 %v2331_v8  ;;  %656 = vmatpush1.bf16.msra.mxu1 %v2334_v12  ;;  %v2359_v33 = vld [vmem:[#allocation6] ss:$8 sps:$4 sm:$0xff]   ;;  %v2365_v37 = vld [vmem:[#allocation6 + $0x10] ss:$8 sps:$4 sm:$0xff]   ;;  %v2370_v38 = vld [vmem:[#allocation2 + $0x24] ss:$8 sps:$4 sm:$0xff]  }
  0x3e   :  { %251 = vmatprep.mubr.bf16.mxu0 %v2543_v6  ;;  %364 = vmatprep.mubr.bf16.mxu1 %v2543_v6  ;;  %v2373_v39 = vld [vmem:[#allocation6 + $0x24] ss:$8 sps:$4 sm:$0xff]   ;;  %v2368_v41 = vld [vmem:[#allocation2 + $0x20] ss:$8 sps:$4 sm:$0xff]   ;;  %v2376_v43 = vld [vmem:[#allocation2 + $0x34] ss:$8 sps:$4 sm:$0xff]  }
  0x3f   :  { %2172 = vmatprep.subr.msk.bf16.mxu0 %vm196_vm0, %v2169_v16  ;;  %2181 = vmatprep.subr.msk.bf16.mxu1 %vm196_vm0, %v2171_v17  ;;  %v2349_v40 = vld [vmem:[%s3230_s0 + $0x8] sm:$0xff]   ;;  %v2379_v44 = vld [vmem:[#allocation6 + $0x34] ss:$8 sps:$4 sm:$0xff]   ;;  %v2374_v45 = vld [vmem:[#allocation2 + $0x30] ss:$8 sps:$4 sm:$0xff]   ;;  %vm1938_vm7 = vcmask 392512  }
  0x40   :  { %v2371_v42 = vld [vmem:[#allocation6 + $0x20] ss:$8 sps:$4 sm:$0xff]   ;;  %v2377_v46 = vld [vmem:[#allocation6 + $0x30] ss:$8 sps:$4 sm:$0xff]   ;;  %v2382_v47 = vld [vmem:[#allocation2 + $0x44] ss:$8 sps:$4 sm:$0xff]  }
  0x41   :  { %545 = vmatpush1.bf16.msra.mxu0 %v531_v21  ;;  %658 = vmatpush1.bf16.msra.mxu1 %v537_v22  ;;  %v2385_v48 = vld [vmem:[#allocation6 + $0x44] ss:$8 sps:$4 sm:$0xff]   ;;  %v2380_v50 = vld [vmem:[#allocation2 + $0x40] ss:$8 sps:$4 sm:$0xff]   ;;  %v2388_v52 = vld [vmem:[#allocation2 + $0x54] ss:$8 sps:$4 sm:$0xff]  }
  0x42   :  { %1154 = vmatprep.subr.bf16.mxu0 %v2358_v24  ;;  %1503 = vmatprep.subr.bf16.mxu1 %v2361_v25  ;;  %v2383_v51 = vld [vmem:[#allocation6 + $0x40] ss:$8 sps:$4 sm:$0xff]   ;;  %v2391_v53 = vld [vmem:[#allocation6 + $0x54] ss:$8 sps:$4 sm:$0xff]   ;;  %v2386_v54 = vld [vmem:[#allocation2 + $0x50] ss:$8 sps:$4 sm:$0xff]  }
  0x43   :  { %v2389_v55 = vld [vmem:[#allocation6 + $0x50] ss:$8 sps:$4 sm:$0xff]   ;;  %v2394_v56 = vld [vmem:[#allocation2 + $0x64] ss:$8 sps:$4 sm:$0xff]   ;;  %v2392_v59 = vld [vmem:[#allocation2 + $0x60] ss:$8 sps:$4 sm:$0xff]  }
  0x44   :  { %2140 = vmatmul.mubr.msk.bf16.gmra.mrb[4].mxu0 %vm171_vm1, %v2337_v20  ;;  %2149 = vmatmul.mubr.msk.bf16.gmra.mrb[4].mxu1 %vm171_vm1, %v2337_v20  ;;  %v2397_v57 = vld [vmem:[#allocation6 + $0x64] ss:$8 sps:$4 sm:$0xff]   ;;  %v2351_v58 = vld [vmem:[%s3230_s0 + $0x18] sm:$0xff]   ;;  %v2395_v60 = vld [vmem:[#allocation6 + $0x60] ss:$8 sps:$4 sm:$0xff]   ;;  %vm1945_vm8 = vcmask 458112  }
  0x45   :  { %261 = vmatprep.mubr.bf16.mxu0 %v2543_v6  ;;  %374 = vmatprep.mubr.bf16.mxu1 %v2543_v6  ;;  %v2400_v61 = vld [vmem:[#allocation2 + $0x74] ss:$8 sps:$4 sm:$0xff]   ;;  %v2398_v63 = vld [vmem:[#allocation2 + $0x70] ss:$8 sps:$4 sm:$0xff]   ;;  %v2406_v1 = vld [vmem:[#allocation2 + $0x84] ss:$8 sps:$4 sm:$0xff]  }
  0x46   :  { %v2403_v62 = vld [vmem:[#allocation6 + $0x74] ss:$8 sps:$4 sm:$0xff]   ;;  %v2401_v0 = vld [vmem:[#allocation6 + $0x70] ss:$8 sps:$4 sm:$0xff]   ;;  %v2409_v2 = vld [vmem:[#allocation6 + $0x84] ss:$8 sps:$4 sm:$0xff]  }
  0x47   :  { %v2352_v3 = vld [vmem:[%s3230_s0 + $0x20] sm:$0xff]   ;;  %v2412_v7 = vld [vmem:[#allocation2 + $0x94] ss:$8 sps:$4 sm:$0xff]   ;;  %v2410_v9 = vld [vmem:[#allocation2 + $0x90] ss:$8 sps:$4 sm:$0xff]   ;;  %vm1952_vm9 = vcmask 523712  }
  0x48   :  { %v2404_v4 = vld [vmem:[#allocation2 + $0x80] ss:$8 sps:$4 sm:$0xff]   ;;  %v2415_v8 = vld [vmem:[#allocation6 + $0x94] ss:$8 sps:$4 sm:$0xff]   ;;  %v2413_v10 = vld [vmem:[#allocation6 + $0x90] ss:$8 sps:$4 sm:$0xff]  }
  0x49   :  { %v2407_v5 = vld [vmem:[#allocation6 + $0x80] ss:$8 sps:$4 sm:$0xff]   ;;  %v2418_v11 = vld [vmem:[#allocation2 + $0xa4] ss:$8 sps:$4 sm:$0xff]   ;;  %v2424_v16 = vld [vmem:[#allocation2 + $0xb4] ss:$8 sps:$4 sm:$0xff]  }
  0x4a   :  { %v2421_v12 = vld [vmem:[#allocation6 + $0xa4] ss:$8 sps:$4 sm:$0xff]   ;;  %v2416_v14 = vld [vmem:[#allocation2 + $0xa0] ss:$8 sps:$4 sm:$0xff]   ;;  %v2427_v17 = vld [vmem:[#allocation6 + $0xb4] ss:$8 sps:$4 sm:$0xff]  }
  0x4b   :  { %v2353_v13 = vld [vmem:[%s3230_s0 + $0x28] sm:$0xff]   ;;  %v2422_v18 = vld [vmem:[#allocation2 + $0xb0] ss:$8 sps:$4 sm:$0xff]   ;;  %v2436_v25 = vld [vmem:[#allocation2 + $0xd4] ss:$8 sps:$4 sm:$0xff]   ;;  %vm1959_vm10 = vcmask 589312  }
  0x4c   :  { %2141 = vmatmul.mubr.msk.bf16.gmra.mrb[8].mxu0 %vm171_vm1, %v2338_v23  ;;  %2150 = vmatmul.mubr.msk.bf16.gmra.mrb[8].mxu1 %vm171_vm1, %v2338_v23  ;;  %v2419_v15 = vld [vmem:[#allocation6 + $0xa0] ss:$8 sps:$4 sm:$0xff]   ;;  %v2425_v19 = vld [vmem:[#allocation6 + $0xb0] ss:$8 sps:$4 sm:$0xff]   ;;  %v2430_v20 = vld [vmem:[#allocation2 + $0xc4] ss:$8 sps:$4 sm:$0xff]  }
  0x4d   :  { %271 = vmatprep.mubr.bf16.mxu0 %v2543_v6  ;;  %384 = vmatprep.mubr.bf16.mxu1 %v2543_v6  ;;  %v2433_v21 = vld [vmem:[#allocation6 + $0xc4] ss:$8 sps:$4 sm:$0xff]   ;;  %v2354_v22 = vld [vmem:[%s3230_s0 + $0x30] sm:$0xff]   ;;  %v2428_v23 = vld [vmem:[#allocation2 + $0xc0] ss:$8 sps:$4 sm:$0xff]   ;;  %vm1966_vm11 = vcmask 654912  }
  0x4e   :  { %v2431_v24 = vld [vmem:[#allocation6 + $0xc0] ss:$8 sps:$4 sm:$0xff]   ;;  %vm1973_vm12 = vcmask 720512   ;;  %vm1980_vm13 = vcmask 786112   ;;  %vm1987_vm14 = vcmask 851712   ;;  %vm1994_vm15 = vcmask 917312  }
  0x4f   :  { %vm2001_vm0 = vcmask 982912  }
  0x54   :  { %2142 = vmatmul.mubr.msk.bf16.gmra.mrb[12].mxu0 %vm171_vm1, %v2339_v26  ;;  %2151 = vmatmul.mubr.msk.bf16.gmra.mrb[12].mxu1 %vm171_vm1, %v2339_v26  ;;  %v2439_v26 = vld [vmem:[#allocation6 + $0xd4] ss:$8 sps:$4 sm:$0xff]  }
  0x55   :  { %281 = vmatprep.mubr.bf16.mxu0 %v2543_v6  ;;  %394 = vmatprep.mubr.bf16.mxu1 %v2543_v6 }
  0x5c   :  { %2143 = vmatmul.mubr.msk.bf16.gmra.mrb[16].mxu0 %vm171_vm1, %v2340_v27  ;;  %2152 = vmatmul.mubr.msk.bf16.gmra.mrb[16].mxu1 %vm171_vm1, %v2340_v27  ;;  %v2434_v27 = vld [vmem:[#allocation2 + $0xd0] ss:$8 sps:$4 sm:$0xff]  }
  0x5d   :  { %291 = vmatprep.mubr.bf16.mxu0 %v2543_v6  ;;  %404 = vmatprep.mubr.bf16.mxu1 %v2543_v6 }
  0x64   :  { %2144 = vmatmul.mubr.msk.bf16.gmra.mrb[20].mxu0 %vm171_vm1, %v2345_v28  ;;  %2153 = vmatmul.mubr.msk.bf16.gmra.mrb[20].mxu1 %vm171_vm1, %v2345_v28  ;;  %v2437_v28 = vld [vmem:[#allocation6 + $0xd0] ss:$8 sps:$4 sm:$0xff]  }
  0x65   :  { %301 = vmatprep.mubr.bf16.mxu0 %v2543_v6  ;;  %414 = vmatprep.mubr.bf16.mxu1 %v2543_v6 }
  0x6c   :  { %2145 = vmatmul.mubr.msk.bf16.gmra.mrb[24].mxu0 %vm171_vm1, %v2346_v29  ;;  %2154 = vmatmul.mubr.msk.bf16.gmra.mrb[24].mxu1 %vm171_vm1, %v2346_v29  ;;  %v2355_v29 = vld [vmem:[%s3230_s0 + $0x38] sm:$0xff]  }
  0x6d   :  { %311 = vmatprep.mubr.bf16.mxu0 %v2543_v6  ;;  %424 = vmatprep.mubr.bf16.mxu1 %v2543_v6 }
  0x74   :  { %2146 = vmatmul.mubr.msk.bf16.gmra.mrb[28].mxu0 %vm171_vm1, %v2347_v30  ;;  %2155 = vmatmul.mubr.msk.bf16.gmra.mrb[28].mxu1 %vm171_vm1, %v2347_v30  ;;  %v2442_v30 = vld [vmem:[#allocation2 + $0xe4] ss:$8 sps:$4 sm:$0xff]   ;;  %vm2008_vm1 = vcmask 1048512  }
  0x75   :  { %574 = vmatprep.mubr.bf16.mxu0 %v2543_v6  ;;  %687 = vmatprep.mubr.bf16.mxu1 %v2543_v6 }
  0x7c   :  { %2173 = vmatmul.mubr.msk.bf16.vlgmr.msra.gmra.mrb[0].mxu0 %vm505_vm2, %v2348_v31  ;;  %2182 = vmatmul.mubr.msk.bf16.vlgmr.msra.gmra.mrb[0].mxu1 %vm505_vm2, %v2348_v31  ;;  %v2445_v31 = vld [vmem:[#allocation6 + $0xe4] ss:$8 sps:$4 sm:$0xff]  }
  0x7d   :  { %584 = vmatprep.mubr.bf16.mxu0 %v2543_v6  ;;  %697 = vmatprep.mubr.bf16.mxu1 %v2543_v6 }
  0x7e   :  { %1155 = vmatpush1.bf16.msra.mxu0 %v2356_v32  ;;  %1504 = vmatpush1.bf16.msra.mxu1 %v2359_v33  ;;  %v2440_v32 = vld [vmem:[#allocation2 + $0xe0] ss:$8 sps:$4 sm:$0xff]   ;;  %v2448_v33 = vld [vmem:[#allocation2 + $0xf4] ss:$8 sps:$4 sm:$0xff]  }
  0x7f   :  { %1156 = vmatprep.subr.bf16.mxu0 %v2364_v34  ;;  %1505 = vmatprep.subr.bf16.mxu1 %v2367_v35  ;;  %v2451_v34 = vld [vmem:[#allocation6 + $0xf4] ss:$8 sps:$4 sm:$0xff]   ;;  %v2446_v35 = vld [vmem:[#allocation2 + $0xf0] ss:$8 sps:$4 sm:$0xff]  }
  0x82   :  { %1157 = vmatpush1.bf16.msra.mxu0 %v2362_v36  ;;  %1506 = vmatpush1.bf16.msra.mxu1 %v2365_v37  ;;  %v2449_v36 = vld [vmem:[#allocation6 + $0xf0] ss:$8 sps:$4 sm:$0xff]   ;;  %v770_v37 = vlaneseq }
  0x83   :  { %1158 = vmatprep.subr.bf16.mxu0 %v2370_v38  ;;  %1507 = vmatprep.subr.bf16.mxu1 %v2373_v39 }
  0x84   :  { %2174 = vmatmul.mubr.msk.bf16.gmra.mrb[4].mxu0 %vm505_vm2, %v2349_v40  ;;  %2183 = vmatmul.mubr.msk.bf16.gmra.mrb[4].mxu1 %vm505_vm2, %v2349_v40  ;;  %v2777_v38 = vshrl.u32 %v770_v37, 7 }
  0x85   :  { %594 = vmatprep.mubr.bf16.mxu0 %v2543_v6  ;;  %707 = vmatprep.mubr.bf16.mxu1 %v2543_v6 }
  0x86   :  { %1159 = vmatpush1.bf16.msra.mxu0 %v2368_v41  ;;  %1508 = vmatpush1.bf16.msra.mxu1 %v2371_v42  ;;  %v2780_v39 = vsub.s32 0, %v2777_v38  ;;  %v780_v40 = vsub.s32 2, %v2777_v38  ;;  %v768_v41 = vld [vmem:[%s3234_s4] sm:$0xf]  ;;  %v2787_v42 = vsub.s32 1, %v2777_v38 }
  0x87   :  { %1160 = vmatprep.subr.bf16.mxu0 %v2376_v43  ;;  %1509 = vmatprep.subr.bf16.mxu1 %v2379_v44  ;;  %v784_v43 = vsub.s32 3, %v2777_v38 }
  0x88   :  { %v2791_v44 = vrot.slane %v768_v41, %v2780_v39 }
  0x8a   :  { %1161 = vmatpush1.bf16.msra.mxu0 %v2374_v45  ;;  %1510 = vmatpush1.bf16.msra.mxu1 %v2377_v46  ;;  %v2795_v45 = vrot.slane %v768_v41, %v780_v40  ;;  %v2798_v46 = vrot.slane %v768_v41, %v2787_v42 }
  0x8b   :  { %1162 = vmatprep.subr.bf16.mxu0 %v2382_v47  ;;  %1511 = vmatprep.subr.bf16.mxu1 %v2385_v48  ;;  %v2802_v47 = vrot.slane %v768_v41, %v784_v43 }
  0x8c   :  { %2175 = vmatmul.mubr.msk.bf16.gmra.mrb[8].mxu0 %vm505_vm2, %v2350_v49  ;;  %2184 = vmatmul.mubr.msk.bf16.gmra.mrb[8].mxu1 %vm505_vm2, %v2350_v49 }
  0x8d   :  { %604 = vmatprep.mubr.bf16.mxu0 %v2543_v6  ;;  %717 = vmatprep.mubr.bf16.mxu1 %v2543_v6 }
  0x8e   :  { %1163 = vmatpush1.bf16.msra.mxu0 %v2380_v50  ;;  %1512 = vmatpush1.bf16.msra.mxu1 %v2383_v51 }
  0x8f   :  { %1164 = vmatprep.subr.bf16.mxu0 %v2388_v52  ;;  %1513 = vmatprep.subr.bf16.mxu1 %v2391_v53 }
  0x92   :  { %1165 = vmatpush1.bf16.msra.mxu0 %v2386_v54  ;;  %1514 = vmatpush1.bf16.msra.mxu1 %v2389_v55 }
  0x93   :  { %1166 = vmatprep.subr.bf16.mxu0 %v2394_v56  ;;  %1515 = vmatprep.subr.bf16.mxu1 %v2397_v57 }
  0x94   :  { %2176 = vmatmul.mubr.msk.bf16.gmra.mrb[12].mxu0 %vm505_vm2, %v2351_v58  ;;  %2185 = vmatmul.mubr.msk.bf16.gmra.mrb[12].mxu1 %vm505_vm2, %v2351_v58 }
  0x95   :  { %614 = vmatprep.mubr.bf16.mxu0 %v2543_v6  ;;  %727 = vmatprep.mubr.bf16.mxu1 %v2543_v6 }
  0x96   :  { %1167 = vmatpush1.bf16.msra.mxu0 %v2392_v59  ;;  %1516 = vmatpush1.bf16.msra.mxu1 %v2395_v60 }
  0x97   :  { %1168 = vmatprep.subr.bf16.mxu0 %v2400_v61  ;;  %1517 = vmatprep.subr.bf16.mxu1 %v2403_v62 }
  0x9a   :  { %1169 = vmatpush1.bf16.msra.mxu0 %v2398_v63  ;;  %1518 = vmatpush1.bf16.msra.mxu1 %v2401_v0 }
  0x9b   :  { %1170 = vmatprep.subr.bf16.mxu0 %v2406_v1  ;;  %1519 = vmatprep.subr.bf16.mxu1 %v2409_v2 }
  0x9c   :  { %2177 = vmatmul.mubr.msk.bf16.gmra.mrb[16].mxu0 %vm505_vm2, %v2352_v3  ;;  %2186 = vmatmul.mubr.msk.bf16.gmra.mrb[16].mxu1 %vm505_vm2, %v2352_v3 }
  0x9d   :  { %624 = vmatprep.mubr.bf16.mxu0 %v2543_v6  ;;  %737 = vmatprep.mubr.bf16.mxu1 %v2543_v6 }
  0x9e   :  { %1171 = vmatpush1.bf16.msra.mxu0 %v2404_v4  ;;  %1520 = vmatpush1.bf16.msra.mxu1 %v2407_v5 }
  0x9f   :  { %1172 = vmatprep.subr.bf16.mxu0 %v2412_v7  ;;  %1521 = vmatprep.subr.bf16.mxu1 %v2415_v8 }
  0xa2   :  { %1173 = vmatpush1.bf16.msra.mxu0 %v2410_v9  ;;  %1522 = vmatpush1.bf16.msra.mxu1 %v2413_v10 }
  0xa3   :  { %1174 = vmatprep.subr.bf16.mxu0 %v2418_v11  ;;  %1523 = vmatprep.subr.bf16.mxu1 %v2421_v12 }
  0xa4   :  { %2178 = vmatmul.mubr.msk.bf16.gmra.mrb[20].mxu0 %vm505_vm2, %v2353_v13  ;;  %2187 = vmatmul.mubr.msk.bf16.gmra.mrb[20].mxu1 %vm505_vm2, %v2353_v13 }
  0xa5   :  { %634 = vmatprep.mubr.bf16.mxu0 %v2543_v6  ;;  %747 = vmatprep.mubr.bf16.mxu1 %v2543_v6 }
  0xa6   :  { %1175 = vmatpush1.bf16.msra.mxu0 %v2416_v14  ;;  %1524 = vmatpush1.bf16.msra.mxu1 %v2419_v15 }
  0xa7   :  { %1176 = vmatprep.subr.bf16.mxu0 %v2424_v16  ;;  %1525 = vmatprep.subr.bf16.mxu1 %v2427_v17 }
  0xaa   :  { %1177 = vmatpush1.bf16.msra.mxu0 %v2422_v18  ;;  %1526 = vmatpush1.bf16.msra.mxu1 %v2425_v19 }
  0xab   :  { %1178 = vmatprep.subr.bf16.mxu0 %v2430_v20  ;;  %1527 = vmatprep.subr.bf16.mxu1 %v2433_v21 }
  0xac   :  { %2179 = vmatmul.mubr.msk.bf16.gmra.mrb[24].mxu0 %vm505_vm2, %v2354_v22  ;;  %2188 = vmatmul.mubr.msk.bf16.gmra.mrb[24].mxu1 %vm505_vm2, %v2354_v22 }
  0xad   :  { %644 = vmatprep.mubr.bf16.mxu0 %v2543_v6  ;;  %757 = vmatprep.mubr.bf16.mxu1 %v2543_v6  ;;  %v2443_v6 = vld [vmem:[#allocation6 + $0xe0] ss:$8 sps:$4 sm:$0xff]  }
  0xae   :  { %1179 = vmatpush1.bf16.msra.mxu0 %v2428_v23  ;;  %1528 = vmatpush1.bf16.msra.mxu1 %v2431_v24 }
  0xaf   :  { %1180 = vmatprep.subr.bf16.mxu0 %v2436_v25  ;;  %1529 = vmatprep.subr.bf16.mxu1 %v2439_v26 }
  0xb2   :  { %1181 = vmatpush1.bf16.msra.mxu0 %v2434_v27  ;;  %1530 = vmatpush1.bf16.msra.mxu1 %v2437_v28 }
  0xb3   :  { %1182 = vmatprep.subr.bf16.mxu0 %v2442_v30  ;;  %1531 = vmatprep.subr.bf16.mxu1 %v2445_v31 }
  0xb4   :  { %2180 = vmatmul.mubr.msk.bf16.gmra.mrb[28].mxu0 %vm505_vm2, %v2355_v29  ;;  %2189 = vmatmul.mubr.msk.bf16.gmra.mrb[28].mxu1 %vm505_vm2, %v2355_v29 }
  0xb6   :  { %1183 = vmatpush1.bf16.msra.mxu0 %v2440_v32  ;;  %1532 = vmatpush1.bf16.msra.mxu1 %v2443_v6 }
  0xb7   :  { %1184 = vmatprep.subr.bf16.mxu0 %v2448_v33  ;;  %1533 = vmatprep.subr.bf16.mxu1 %v2451_v34 }
  0xba   :  { %1185 = vmatpush1.bf16.msra.mxu0 %v2446_v35  ;;  %1534 = vmatpush1.bf16.msra.mxu1 %v2449_v36 }
 0x14f   :  { %v576_v48 = vpop.f32.mrb[0].mxu0  ;;  %v689_v49 = vpop.f32.mrb[0].mxu1 }
 0x150   :  { %v790_v50 = vadd.f32 %v2791_v44, %v576_v48  ;;  %v792_v51 = vadd.f32 %v2795_v45, %v689_v49  ;;  %v578_v52 = vpop.f32.mrb[1].mxu0  ;;  %v691_v53 = vpop.f32.mrb[1].mxu1 }
 0x151   :  { %v791_v54 = vadd.f32 %v2798_v46, %v578_v52  ;;  %v793_v55 = vadd.f32 %v2802_v47, %v691_v53  ;;  %v580_v56 = vpop.f32.mrb[2].mxu0  ;;  %v693_v57 = vpop.f32.mrb[2].mxu1 }
 0x152   :  { %v794_v58 = vadd.f32 %v2791_v44, %v580_v56  ;;  %v796_v59 = vadd.f32 %v2795_v45, %v693_v57  ;;  %v582_v60 = vpop.f32.mrb[3].mxu0  ;;  %v695_v61 = vpop.f32.mrb[3].mxu1  ;;  %v854_v0 = vmax.f32 %v790_v50, 0.0  ;;  %v856_v1 = vmax.f32 %v792_v51, 0.0 }
 0x153   :  { %v795_v62 = vadd.f32 %v2798_v46, %v582_v60  ;;  %v797_v63 = vadd.f32 %v2802_v47, %v695_v61  ;;  %v855_v4 = vmax.f32 %v791_v54, 0.0  ;;  %v857_v5 = vmax.f32 %v793_v55, 0.0 }
 0x154   :  { %v858_v2 = vmax.f32 %v794_v58, 0.0  ;;  %v860_v3 = vmax.f32 %v796_v59, 0.0 }
 0x155   :  { %v859_v7 = vmax.f32 %v795_v62, 0.0  ;;  %v861_v8 = vmax.f32 %v797_v63, 0.0 }
 0x156   :  { %v918_v9 = vpack.c.bf16 %v858_v2, %v854_v0  ;;  %v934_v10 = vpack.c.bf16 %v860_v3, %v856_v1 }
 0x157   :  { %v919_v11 = vpack.c.bf16 %v859_v7, %v855_v4  ;;  %v935_v12 = vpack.c.bf16 %v861_v8, %v857_v5  ;;  %v586_v13 = vpop.f32.mrb[4].mxu0  ;;  %v699_v14 = vpop.f32.mrb[4].mxu1 }
 0x158   :  { %v798_v15 = vadd.f32 %v2791_v44, %v586_v13  ;;  %v800_v16 = vadd.f32 %v2795_v45, %v699_v14  ;;  %v588_v17 = vpop.f32.mrb[5].mxu0  ;;  %v701_v18 = vpop.f32.mrb[5].mxu1 }
 0x159   :  { %v799_v19 = vadd.f32 %v2798_v46, %v588_v17  ;;  %v801_v20 = vadd.f32 %v2802_v47, %v701_v18  ;;  %v590_v21 = vpop.f32.mrb[6].mxu0  ;;  %v703_v22 = vpop.f32.mrb[6].mxu1  ;;  %1186 = vmatprep.mubr.bf16.mxu0 %v919_v11  ;;  %1535 = vmatprep.mubr.bf16.mxu1 %v935_v12 }
 0x15a   :  { %v802_v23 = vadd.f32 %v2791_v44, %v590_v21  ;;  %v804_v24 = vadd.f32 %v2795_v45, %v703_v22  ;;  %v592_v25 = vpop.f32.mrb[7].mxu0  ;;  %v705_v26 = vpop.f32.mrb[7].mxu1  ;;  %1187 = vmatmul.mubr.bf16.vlgmr.msra.gmra.mrb[32].mxu0 %v918_v9  ;;  %1536 = vmatmul.mubr.bf16.vlgmr.msra.gmra.mrb[32].mxu1 %v934_v10  ;;  %v862_v29 = vmax.f32 %v798_v15, 0.0  ;;  %v864_v30 = vmax.f32 %v800_v16, 0.0 }
 0x15b   :  { %v803_v27 = vadd.f32 %v2798_v46, %v592_v25  ;;  %v805_v28 = vadd.f32 %v2802_v47, %v705_v26  ;;  %v863_v6 = vmax.f32 %v799_v19, 0.0  ;;  %v865_v33 = vmax.f32 %v801_v20, 0.0 }
 0x15c   :  { %v866_v31 = vmax.f32 %v802_v23, 0.0  ;;  %v868_v32 = vmax.f32 %v804_v24, 0.0 }
 0x15d   :  { %v867_v34 = vmax.f32 %v803_v27, 0.0  ;;  %v869_v35 = vmax.f32 %v805_v28, 0.0 }
 0x15e   :  { %v920_v36 = vpack.c.bf16 %v866_v31, %v862_v29  ;;  %v936_v41 = vpack.c.bf16 %v868_v32, %v864_v30 }
 0x15f   :  { %v921_v48 = vpack.c.bf16 %v867_v34, %v863_v6  ;;  %v937_v49 = vpack.c.bf16 %v869_v35, %v865_v33  ;;  %v596_v50 = vpop.f32.mrb[8].mxu0  ;;  %v709_v51 = vpop.f32.mrb[8].mxu1 }
 0x160   :  { %v806_v52 = vadd.f32 %v2791_v44, %v596_v50  ;;  %v808_v53 = vadd.f32 %v2795_v45, %v709_v51  ;;  %v598_v54 = vpop.f32.mrb[9].mxu0  ;;  %v711_v55 = vpop.f32.mrb[9].mxu1 }
 0x161   :  { %v807_v56 = vadd.f32 %v2798_v46, %v598_v54  ;;  %v809_v57 = vadd.f32 %v2802_v47, %v711_v55  ;;  %v600_v58 = vpop.f32.mrb[10].mxu0  ;;  %v713_v59 = vpop.f32.mrb[10].mxu1  ;;  %1196 = vmatprep.mubr.bf16.mxu0 %v921_v48  ;;  %1545 = vmatprep.mubr.bf16.mxu1 %v937_v49 }
 0x162   :  { %v810_v60 = vadd.f32 %v2791_v44, %v600_v58  ;;  %v812_v61 = vadd.f32 %v2795_v45, %v713_v59  ;;  %v602_v62 = vpop.f32.mrb[11].mxu0  ;;  %v715_v63 = vpop.f32.mrb[11].mxu1  ;;  %1197 = vmatmul.mubr.bf16.gmra.mrb[36].mxu0 %v920_v36  ;;  %1546 = vmatmul.mubr.bf16.gmra.mrb[36].mxu1 %v936_v41  ;;  %v870_v2 = vmax.f32 %v806_v52, 0.0  ;;  %v872_v3 = vmax.f32 %v808_v53, 0.0 }
 0x163   :  { %v811_v0 = vadd.f32 %v2798_v46, %v602_v62  ;;  %v813_v1 = vadd.f32 %v2802_v47, %v715_v63  ;;  %v871_v7 = vmax.f32 %v807_v56, 0.0  ;;  %v873_v8 = vmax.f32 %v809_v57, 0.0 }
 0x164   :  { %v874_v4 = vmax.f32 %v810_v60, 0.0  ;;  %v876_v5 = vmax.f32 %v812_v61, 0.0 }
 0x165   :  { %v875_v9 = vmax.f32 %v811_v0, 0.0  ;;  %v877_v10 = vmax.f32 %v813_v1, 0.0 }
 0x166   :  { %v922_v11 = vpack.c.bf16 %v874_v4, %v870_v2  ;;  %v938_v12 = vpack.c.bf16 %v876_v5, %v872_v3 }
 0x167   :  { %v923_v13 = vpack.c.bf16 %v875_v9, %v871_v7  ;;  %v939_v14 = vpack.c.bf16 %v877_v10, %v873_v8  ;;  %v606_v15 = vpop.f32.mrb[12].mxu0  ;;  %v719_v16 = vpop.f32.mrb[12].mxu1 }
 0x168   :  { %v814_v17 = vadd.f32 %v2791_v44, %v606_v15  ;;  %v816_v18 = vadd.f32 %v2795_v45, %v719_v16  ;;  %v608_v19 = vpop.f32.mrb[13].mxu0  ;;  %v721_v20 = vpop.f32.mrb[13].mxu1 }
 0x169   :  { %v815_v21 = vadd.f32 %v2798_v46, %v608_v19  ;;  %v817_v22 = vadd.f32 %v2802_v47, %v721_v20  ;;  %v610_v23 = vpop.f32.mrb[14].mxu0  ;;  %v723_v24 = vpop.f32.mrb[14].mxu1  ;;  %1206 = vmatprep.mubr.bf16.mxu0 %v923_v13  ;;  %1555 = vmatprep.mubr.bf16.mxu1 %v939_v14 }
 0x16a   :  { %v818_v25 = vadd.f32 %v2791_v44, %v610_v23  ;;  %v820_v26 = vadd.f32 %v2795_v45, %v723_v24  ;;  %v612_v27 = vpop.f32.mrb[15].mxu0  ;;  %v725_v28 = vpop.f32.mrb[15].mxu1  ;;  %1207 = vmatmul.mubr.bf16.gmra.mrb[40].mxu0 %v922_v11  ;;  %1556 = vmatmul.mubr.bf16.gmra.mrb[40].mxu1 %v938_v12  ;;  %v878_v31 = vmax.f32 %v814_v17, 0.0  ;;  %v880_v32 = vmax.f32 %v816_v18, 0.0 }
 0x16b   :  { %v819_v29 = vadd.f32 %v2798_v46, %v612_v27  ;;  %v821_v30 = vadd.f32 %v2802_v47, %v725_v28  ;;  %v879_v34 = vmax.f32 %v815_v21, 0.0  ;;  %v881_v35 = vmax.f32 %v817_v22, 0.0 }
 0x16c   :  { %v882_v6 = vmax.f32 %v818_v25, 0.0  ;;  %v884_v33 = vmax.f32 %v820_v26, 0.0 }
 0x16d   :  { %v883_v36 = vmax.f32 %v819_v29, 0.0  ;;  %v885_v41 = vmax.f32 %v821_v30, 0.0 }
 0x16e   :  { %v924_v48 = vpack.c.bf16 %v882_v6, %v878_v31  ;;  %v940_v49 = vpack.c.bf16 %v884_v33, %v880_v32 }
 0x16f   :  { %v925_v50 = vpack.c.bf16 %v883_v36, %v879_v34  ;;  %v941_v51 = vpack.c.bf16 %v885_v41, %v881_v35  ;;  %v616_v52 = vpop.f32.mrb[16].mxu0  ;;  %v729_v53 = vpop.f32.mrb[16].mxu1 }
 0x170   :  { %v822_v54 = vadd.f32 %v2791_v44, %v616_v52  ;;  %v824_v55 = vadd.f32 %v2795_v45, %v729_v53  ;;  %v618_v56 = vpop.f32.mrb[17].mxu0  ;;  %v731_v57 = vpop.f32.mrb[17].mxu1 }
 0x171   :  { %v823_v58 = vadd.f32 %v2798_v46, %v618_v56  ;;  %v825_v59 = vadd.f32 %v2802_v47, %v731_v57  ;;  %v620_v60 = vpop.f32.mrb[18].mxu0  ;;  %v733_v61 = vpop.f32.mrb[18].mxu1  ;;  %1216 = vmatprep.mubr.bf16.mxu0 %v925_v50  ;;  %1565 = vmatprep.mubr.bf16.mxu1 %v941_v51 }
 0x172   :  { %v826_v62 = vadd.f32 %v2791_v44, %v620_v60  ;;  %v828_v63 = vadd.f32 %v2795_v45, %v733_v61  ;;  %v622_v0 = vpop.f32.mrb[19].mxu0  ;;  %v735_v1 = vpop.f32.mrb[19].mxu1  ;;  %1217 = vmatmul.mubr.bf16.gmra.mrb[44].mxu0 %v924_v48  ;;  %1566 = vmatmul.mubr.bf16.gmra.mrb[44].mxu1 %v940_v49  ;;  %v886_v4 = vmax.f32 %v822_v54, 0.0  ;;  %v888_v5 = vmax.f32 %v824_v55, 0.0 }
 0x173   :  { %v827_v2 = vadd.f32 %v2798_v46, %v622_v0  ;;  %v829_v3 = vadd.f32 %v2802_v47, %v735_v1  ;;  %v887_v9 = vmax.f32 %v823_v58, 0.0  ;;  %v889_v10 = vmax.f32 %v825_v59, 0.0 }
 0x174   :  { %v890_v7 = vmax.f32 %v826_v62, 0.0  ;;  %v892_v8 = vmax.f32 %v828_v63, 0.0 }
 0x175   :  { %v891_v11 = vmax.f32 %v827_v2, 0.0  ;;  %v893_v12 = vmax.f32 %v829_v3, 0.0 }
 0x176   :  { %v926_v13 = vpack.c.bf16 %v890_v7, %v886_v4  ;;  %v942_v14 = vpack.c.bf16 %v892_v8, %v888_v5 }
 0x177   :  { %v927_v15 = vpack.c.bf16 %v891_v11, %v887_v9  ;;  %v943_v16 = vpack.c.bf16 %v893_v12, %v889_v10  ;;  %v626_v17 = vpop.f32.mrb[20].mxu0  ;;  %v739_v18 = vpop.f32.mrb[20].mxu1 }
 0x178   :  { %v830_v19 = vadd.f32 %v2791_v44, %v626_v17  ;;  %v832_v20 = vadd.f32 %v2795_v45, %v739_v18  ;;  %v628_v21 = vpop.f32.mrb[21].mxu0  ;;  %v741_v22 = vpop.f32.mrb[21].mxu1 }
 0x179   :  { %v831_v23 = vadd.f32 %v2798_v46, %v628_v21  ;;  %v833_v24 = vadd.f32 %v2802_v47, %v741_v22  ;;  %v630_v25 = vpop.f32.mrb[22].mxu0  ;;  %v743_v26 = vpop.f32.mrb[22].mxu1  ;;  %1226 = vmatprep.mubr.bf16.mxu0 %v927_v15  ;;  %1575 = vmatprep.mubr.bf16.mxu1 %v943_v16 }
 0x17a   :  { %v834_v27 = vadd.f32 %v2791_v44, %v630_v25  ;;  %v836_v28 = vadd.f32 %v2795_v45, %v743_v26  ;;  %v632_v29 = vpop.f32.mrb[23].mxu0  ;;  %v745_v30 = vpop.f32.mrb[23].mxu1  ;;  %1227 = vmatmul.mubr.bf16.gmra.mrb[48].mxu0 %v926_v13  ;;  %1576 = vmatmul.mubr.bf16.gmra.mrb[48].mxu1 %v942_v14  ;;  %v894_v6 = vmax.f32 %v830_v19, 0.0  ;;  %v896_v33 = vmax.f32 %v832_v20, 0.0 }
 0x17b   :  { %v835_v31 = vadd.f32 %v2798_v46, %v632_v29  ;;  %v837_v32 = vadd.f32 %v2802_v47, %v745_v30  ;;  %v895_v36 = vmax.f32 %v831_v23, 0.0  ;;  %v897_v41 = vmax.f32 %v833_v24, 0.0 }
 0x17c   :  { %v898_v34 = vmax.f32 %v834_v27, 0.0  ;;  %v900_v35 = vmax.f32 %v836_v28, 0.0 }
 0x17d   :  { %v899_v48 = vmax.f32 %v835_v31, 0.0  ;;  %v901_v49 = vmax.f32 %v837_v32, 0.0 }
 0x17e   :  { %v928_v50 = vpack.c.bf16 %v898_v34, %v894_v6  ;;  %v944_v51 = vpack.c.bf16 %v900_v35, %v896_v33 }
 0x17f   :  { %v929_v52 = vpack.c.bf16 %v899_v48, %v895_v36  ;;  %v945_v53 = vpack.c.bf16 %v901_v49, %v897_v41  ;;  %v636_v54 = vpop.f32.mrb[24].mxu0  ;;  %v749_v55 = vpop.f32.mrb[24].mxu1 }
 0x180   :  { %v838_v56 = vadd.f32 %v2791_v44, %v636_v54  ;;  %v840_v57 = vadd.f32 %v2795_v45, %v749_v55  ;;  %v638_v58 = vpop.f32.mrb[25].mxu0  ;;  %v751_v59 = vpop.f32.mrb[25].mxu1  ;;  %v982_v54 = vld [vmem:[%s3236_s6] sm:$0x3]  ;;  %s2254_s6 = sld [smem:[#allocation8 + $0x1]] }
 0x181   :  { %v839_v60 = vadd.f32 %v2798_v46, %v638_v58  ;;  %v841_v61 = vadd.f32 %v2802_v47, %v751_v59  ;;  %v640_v62 = vpop.f32.mrb[26].mxu0  ;;  %v753_v63 = vpop.f32.mrb[26].mxu1  ;;  %1236 = vmatprep.mubr.bf16.mxu0 %v929_v52  ;;  %1585 = vmatprep.mubr.bf16.mxu1 %v945_v53  ;;  %v1331_v55 = vld [vmem:[%s3238_s8] sm:$0x3]  ;;  %s1749_s8 = sld [smem:[#allocation8]] }
 0x182   :  { %v842_v0 = vadd.f32 %v2791_v44, %v640_v62  ;;  %v844_v1 = vadd.f32 %v2795_v45, %v753_v63  ;;  %v642_v2 = vpop.f32.mrb[27].mxu0  ;;  %v755_v3 = vpop.f32.mrb[27].mxu1  ;;  %1237 = vmatmul.mubr.bf16.gmra.mrb[52].mxu0 %v928_v50  ;;  %1586 = vmatmul.mubr.bf16.gmra.mrb[52].mxu1 %v944_v51  ;;  %v902_v7 = vmax.f32 %v838_v56, 0.0  ;;  %v904_v8 = vmax.f32 %v840_v57, 0.0 }
 0x183   :  { %v843_v4 = vadd.f32 %v2798_v46, %v642_v2  ;;  %v845_v5 = vadd.f32 %v2802_v47, %v755_v3  ;;  %v903_v11 = vmax.f32 %v839_v60, 0.0  ;;  %v905_v12 = vmax.f32 %v841_v61, 0.0 }
 0x184   :  { %v906_v9 = vmax.f32 %v842_v0, 0.0  ;;  %v908_v10 = vmax.f32 %v844_v1, 0.0  ;;  %v2878_v56 = vrot.slane %v982_v54, %v2780_v39  ;;  %v2881_v57 = vrot.slane %v1331_v55, %v2780_v39 }
 0x185   :  { %v907_v13 = vmax.f32 %v843_v4, 0.0  ;;  %v909_v14 = vmax.f32 %v845_v5, 0.0  ;;  %v2890_v62 = vrot.slane %v982_v54, %v2787_v42  ;;  %v2893_v63 = vrot.slane %v1331_v55, %v2787_v42 }
 0x186   :  { %v930_v15 = vpack.c.bf16 %v906_v9, %v902_v7  ;;  %v946_v16 = vpack.c.bf16 %v908_v10, %v904_v8 }
 0x187   :  { %v931_v17 = vpack.c.bf16 %v907_v13, %v903_v11  ;;  %v947_v18 = vpack.c.bf16 %v909_v14, %v905_v12  ;;  %v646_v19 = vpop.f32.mrb[28].mxu0  ;;  %v759_v20 = vpop.f32.mrb[28].mxu1 }
 0x188   :  { %v846_v21 = vadd.f32 %v2791_v44, %v646_v19  ;;  %v848_v22 = vadd.f32 %v2795_v45, %v759_v20  ;;  %v648_v23 = vpop.f32.mrb[29].mxu0  ;;  %v761_v24 = vpop.f32.mrb[29].mxu1 }
 0x189   :  { %v847_v25 = vadd.f32 %v2798_v46, %v648_v23  ;;  %v849_v26 = vadd.f32 %v2802_v47, %v761_v24  ;;  %v650_v27 = vpop.f32.mrb[30].mxu0  ;;  %v763_v28 = vpop.f32.mrb[30].mxu1  ;;  %1246 = vmatprep.mubr.bf16.mxu0 %v931_v17  ;;  %1595 = vmatprep.mubr.bf16.mxu1 %v947_v18 }
 0x18a   :  { %v850_v29 = vadd.f32 %v2791_v44, %v650_v27  ;;  %v852_v30 = vadd.f32 %v2795_v45, %v763_v28  ;;  %v652_v31 = vpop.f32.mrb[31].mxu0  ;;  %v765_v32 = vpop.f32.mrb[31].mxu1  ;;  %1247 = vmatmul.mubr.bf16.gmra.mrb[56].mxu0 %v930_v15  ;;  %1596 = vmatmul.mubr.bf16.gmra.mrb[56].mxu1 %v946_v16  ;;  %v910_v34 = vmax.f32 %v846_v21, 0.0  ;;  %v912_v35 = vmax.f32 %v848_v22, 0.0 }
 0x18b   :  { %v851_v6 = vadd.f32 %v2798_v46, %v652_v31  ;;  %v853_v33 = vadd.f32 %v2802_v47, %v765_v32  ;;  %v911_v48 = vmax.f32 %v847_v25, 0.0  ;;  %v913_v49 = vmax.f32 %v849_v26, 0.0  ;;  %v1648_v46 = vld [vmem:[%s3239_s9] sm:$0x3]  ;;  %s2544_s9 = smov [#allocation9]  }
 0x18c   :  { %v914_v36 = vmax.f32 %v850_v29, 0.0  ;;  %v916_v41 = vmax.f32 %v852_v30, 0.0  ;;  %v1649_v47 = vunpack.c.l.bf16 %v1648_v46  ;;  %s2115_s12 = sshll.u32 %s2544_s9, 4  ;;  %s2116_s12 = int_to_ptr.vmem [resolvable:$true] %s2115_s12 }
 0x18d   :  { %v915_v50 = vmax.f32 %v851_v6, 0.0  ;;  %v917_v51 = vmax.f32 %v853_v33, 0.0  ;;  %s2508_s13 = scalar_lea.vmem %s2116_s12, 32  ;;  %p2513_p8 = scmp.lt.s32.totalorder %s2116_s12, %s2116_s12 }
 0x18e   :  { %v932_v52 = vpack.c.bf16 %v914_v36, %v910_v34  ;;  %v948_v44 = vpack.c.bf16 %v916_v41, %v912_v35  ;;  %v1654_v58 = vrot.slane %v1649_v47, %v2780_v39  ;;  %v1770_v59 = vrot.slane %v1649_v47, %v2787_v42  ;;  %p2509_p7 = scmp.ne.s32.totalorder %s2116_s12, %s2508_s13  ;;  %p2514_p9 = scmp.lt.s32.totalorder %s2508_s13, %s2508_s13 }
 0x18f   :  { %v933_v53 = vpack.c.bf16 %v915_v50, %v911_v48  ;;  %v949_v45 = vpack.c.bf16 %v917_v51, %v913_v49  ;;  %v1658_v60 = vrot.slane %v1649_v47, %v780_v40  ;;  %v1774_v61 = vrot.slane %v1649_v47, %v784_v43 }
 0x190   :  { %v2898_v7 = vrot.slane %v1654_v58, %v2780_v39  ;;  %v2901_v40 = vrot.slane %v1770_v59, %v2787_v42  ;;  %p2515_p10 = por %p2514_p9, %p2513_p8 }
 0x191   :  { %1256 = vmatprep.mubr.bf16.mxu0 %v933_v53  ;;  %1605 = vmatprep.mubr.bf16.mxu1 %v949_v45  ;;  %v2906_v11 = vrot.slane %v1658_v60, %v2780_v39  ;;  %v2909_v12 = vrot.slane %v1774_v61, %v2787_v42 }
 0x192   :  { %1257 = vmatmul.mubr.bf16.gmra.mrb[60].mxu0 %v932_v52  ;;  %1606 = vmatmul.mubr.bf16.gmra.mrb[60].mxu1 %v948_v44  ;;  %p2516_p11 = pnand %p2515_p10, %p2509_p7 }
 0x22d   :  { %v1188_v0 = vpop.f32.mrb[32].mxu0  ;;  %v1537_v1 = vpop.f32.mrb[32].mxu1 }
 0x22e   :  { %v1189_v2 = vadd.f32 %v1188_v0, %v2878_v56  ;;  %v1538_v3 = vadd.f32 %v1537_v1, %v2881_v57  ;;  %v1190_v4 = vpop.f32.mrb[33].mxu0  ;;  %v1539_v5 = vpop.f32.mrb[33].mxu1 }
 0x22f   :  { %v1191_v43 = vadd.f32 %v1190_v4, %v2890_v62  ;;  %v1540_v8 = vadd.f32 %v1539_v5, %v2893_v63  ;;  %v1192_v9 = vpop.f32.mrb[34].mxu0  ;;  %v1541_v10 = vpop.f32.mrb[34].mxu1 }
 0x230   :  { %v1267_v13 = vmax.f32 %v1189_v2, 0.0  ;;  %v1616_v14 = vmax.f32 %v1538_v3, 0.0  ;;  %v1193_v15 = vadd.f32 %v1192_v9, %v2878_v56  ;;  %v1542_v16 = vadd.f32 %v1541_v10, %v2881_v57  ;;  %v1194_v17 = vpop.f32.mrb[35].mxu0  ;;  %v1543_v18 = vpop.f32.mrb[35].mxu1 }
 0x231   :  { %v1268_v19 = vmax.f32 %v1191_v43, 0.0  ;;  %v1617_v20 = vmax.f32 %v1540_v8, 0.0  ;;  %v1195_v21 = vadd.f32 %v1194_v17, %v2890_v62  ;;  %v1544_v22 = vadd.f32 %v1543_v18, %v2893_v63 }
 0x232   :  { %v1269_v23 = vmax.f32 %v1193_v15, 0.0  ;;  %v1618_v39 = vmax.f32 %v1542_v16, 0.0  ;;  %v1785_v24 = vmul.f32 %v2901_v40, %v1616_v14  ;;  %v1669_v42 = vmul.f32 %v2898_v7, %v1267_v13 }
 0x233   :  { %v1270_v25 = vmax.f32 %v1195_v21, 0.0  ;;  %v1619_v26 = vmax.f32 %v1544_v22, 0.0  ;;  %v1786_v27 = vmul.f32 %v2909_v12, %v1617_v20  ;;  %v1670_v28 = vmul.f32 %v2906_v11, %v1268_v19 }
 0x234   :  { %v1787_v29 = vmul.f32 %v2901_v40, %v1618_v39  ;;  %v1671_v35 = vmul.f32 %v2898_v7, %v1269_v23 }
 0x235   :  { %v1672_v30 = vmul.f32 %v2906_v11, %v1270_v25  ;;  %v1788_v31 = vmul.f32 %v2909_v12, %v1619_v26  ;;  %v1198_v32 = vpop.f32.mrb[36].mxu0  ;;  %v1547_v6 = vpop.f32.mrb[36].mxu1  ;;  %v1817_v33 = vadd.f32 %v1786_v27, %v1785_v24  ;;  %v1701_v34 = vadd.f32 %v1670_v28, %v1669_v42 }
 0x236   :  { %v1199_v36 = vadd.f32 %v1198_v32, %v2878_v56  ;;  %v1548_v41 = vadd.f32 %v1547_v6, %v2881_v57  ;;  %v1200_v48 = vpop.f32.mrb[37].mxu0  ;;  %v1549_v49 = vpop.f32.mrb[37].mxu1 }
 0x237   :  { %v1201_v50 = vadd.f32 %v1200_v48, %v2890_v62  ;;  %v1550_v51 = vadd.f32 %v1549_v49, %v2893_v63  ;;  %v1551_v52 = vpop.f32.mrb[38].mxu1  ;;  %1818 = vadd.xlane.f32.xlu1 %v1817_v33  ;;  %v1202_v44 = vpop.f32.mrb[38].mxu0  ;;  %1702 = vadd.xlane.f32.xlu0 %v1701_v34  ;;  %v1820_v53 = vadd.f32 %v1788_v31, %v1787_v29 }
 0x238   :  { %v1271_v45 = vmax.f32 %v1199_v36, 0.0  ;;  %v1620_v46 = vmax.f32 %v1548_v41, 0.0  ;;  %v1552_v47 = vadd.f32 %v1551_v52, %v2881_v57  ;;  %v1203_v54 = vadd.f32 %v1202_v44, %v2878_v56  ;;  %v1204_v55 = vpop.f32.mrb[39].mxu0  ;;  %v1553_v58 = vpop.f32.mrb[39].mxu1 }
 0x239   :  { %v1272_v59 = vmax.f32 %v1201_v50, 0.0  ;;  %v1621_v60 = vmax.f32 %v1550_v51, 0.0  ;;  %v1205_v61 = vadd.f32 %v1204_v55, %v2890_v62  ;;  %v1554_v0 = vadd.f32 %v1553_v58, %v2893_v63 }
 0x23a   :  { %v1673_v1 = vmul.f32 %v2898_v7, %v1271_v45  ;;  %v1789_v2 = vmul.f32 %v2901_v40, %v1620_v46  ;;  %v1622_v3 = vmax.f32 %v1552_v47, 0.0  ;;  %v1273_v4 = vmax.f32 %v1203_v54, 0.0 }
 0x23b   :  { %v1674_v5 = vmul.f32 %v2906_v11, %v1272_v59  ;;  %v1790_v43 = vmul.f32 %v2909_v12, %v1621_v60  ;;  %v1274_v8 = vmax.f32 %v1205_v61, 0.0  ;;  %v1623_v9 = vmax.f32 %v1554_v0, 0.0  ;;  %1821 = vadd.xlane.f32.xlu1 %v1820_v53 }
 0x23c   :  { %v1791_v10 = vmul.f32 %v2901_v40, %v1622_v3  ;;  %v1675_v13 = vmul.f32 %v2898_v7, %v1273_v4  ;;  %v1704_v14 = vadd.f32 %v1672_v30, %v1671_v35 }
 0x23d   :  { %v1676_v15 = vmul.f32 %v2906_v11, %v1274_v8  ;;  %v1792_v16 = vmul.f32 %v2909_v12, %v1623_v9  ;;  %v1208_v17 = vpop.f32.mrb[40].mxu0  ;;  %v1557_v18 = vpop.f32.mrb[40].mxu1  ;;  %v1823_v19 = vadd.f32 %v1790_v43, %v1789_v2  ;;  %v1707_v20 = vadd.f32 %v1674_v5, %v1673_v1 }
 0x23e   :  { %1705 = vadd.xlane.f32.xlu0 %v1704_v14  ;;  %v1209_v21 = vadd.f32 %v1208_v17, %v2878_v56  ;;  %v1558_v22 = vadd.f32 %v1557_v18, %v2881_v57  ;;  %v1210_v23 = vpop.f32.mrb[41].mxu0  ;;  %v1559_v39 = vpop.f32.mrb[41].mxu1 }
 0x23f   :  { %v1211_v24 = vadd.f32 %v1210_v23, %v2890_v62  ;;  %v1560_v42 = vadd.f32 %v1559_v39, %v2893_v63  ;;  %v1561_v25 = vpop.f32.mrb[42].mxu1  ;;  %1824 = vadd.xlane.f32.xlu1 %v1823_v19  ;;  %v1212_v26 = vpop.f32.mrb[42].mxu0  ;;  %v1826_v27 = vadd.f32 %v1792_v16, %v1791_v10  ;;  %v1710_v28 = vadd.f32 %v1676_v15, %v1675_v13 }
 0x240   :  { %v1275_v29 = vmax.f32 %v1209_v21, 0.0  ;;  %v1624_v30 = vmax.f32 %v1558_v22, 0.0  ;;  %v1562_v31 = vadd.f32 %v1561_v25, %v2881_v57  ;;  %v1213_v32 = vadd.f32 %v1212_v26, %v2878_v56  ;;  %v1214_v6 = vpop.f32.mrb[43].mxu0  ;;  %v1563_v33 = vpop.f32.mrb[43].mxu1 }
 0x241   :  { %v1276_v34 = vmax.f32 %v1211_v24, 0.0  ;;  %v1625_v35 = vmax.f32 %v1560_v42, 0.0  ;;  %v1215_v36 = vadd.f32 %v1214_v6, %v2890_v62  ;;  %v1564_v41 = vadd.f32 %v1563_v33, %v2893_v63 }
 0x242   :  { %v1677_v48 = vmul.f32 %v2898_v7, %v1275_v29  ;;  %v1793_v49 = vmul.f32 %v2901_v40, %v1624_v30  ;;  %v1626_v50 = vmax.f32 %v1562_v31, 0.0  ;;  %v1277_v51 = vmax.f32 %v1213_v32, 0.0  ;;  %1708 = vadd.xlane.f32.xlu0 %v1707_v20 }
 0x243   :  { %v1678_v52 = vmul.f32 %v2906_v11, %v1276_v34  ;;  %v1794_v44 = vmul.f32 %v2909_v12, %v1625_v35  ;;  %v1278_v53 = vmax.f32 %v1215_v36, 0.0  ;;  %v1627_v45 = vmax.f32 %v1564_v41, 0.0  ;;  %1827 = vadd.xlane.f32.xlu1 %v1826_v27 }
 0x244   :  { %v1795_v46 = vmul.f32 %v2901_v40, %v1626_v50  ;;  %v1679_v47 = vmul.f32 %v2898_v7, %v1277_v51 }
 0x245   :  { %v1680_v54 = vmul.f32 %v2906_v11, %v1278_v53  ;;  %v1796_v55 = vmul.f32 %v2909_v12, %v1627_v45  ;;  %v1218_v58 = vpop.f32.mrb[44].mxu0  ;;  %v1567_v59 = vpop.f32.mrb[44].mxu1  ;;  %v1829_v60 = vadd.f32 %v1794_v44, %v1793_v49  ;;  %v1713_v61 = vadd.f32 %v1678_v52, %v1677_v48 }
 0x246   :  { %1711 = vadd.xlane.f32.xlu0 %v1710_v28  ;;  %v1219_v0 = vadd.f32 %v1218_v58, %v2878_v56  ;;  %v1568_v1 = vadd.f32 %v1567_v59, %v2881_v57  ;;  %v1220_v2 = vpop.f32.mrb[45].mxu0  ;;  %v1569_v3 = vpop.f32.mrb[45].mxu1 }
 0x247   :  { %v1221_v4 = vadd.f32 %v1220_v2, %v2890_v62  ;;  %v1570_v5 = vadd.f32 %v1569_v3, %v2893_v63  ;;  %v1571_v43 = vpop.f32.mrb[46].mxu1  ;;  %1830 = vadd.xlane.f32.xlu1 %v1829_v60  ;;  %v1222_v8 = vpop.f32.mrb[46].mxu0  ;;  %v1832_v9 = vadd.f32 %v1796_v55, %v1795_v46  ;;  %v1716_v10 = vadd.f32 %v1680_v54, %v1679_v47 }
 0x248   :  { %v1279_v13 = vmax.f32 %v1219_v0, 0.0  ;;  %v1628_v14 = vmax.f32 %v1568_v1, 0.0  ;;  %v1572_v15 = vadd.f32 %v1571_v43, %v2881_v57  ;;  %v1223_v16 = vadd.f32 %v1222_v8, %v2878_v56  ;;  %v1224_v17 = vpop.f32.mrb[47].mxu0  ;;  %v1573_v18 = vpop.f32.mrb[47].mxu1 }
 0x249   :  { %v1280_v19 = vmax.f32 %v1221_v4, 0.0  ;;  %v1629_v20 = vmax.f32 %v1570_v5, 0.0  ;;  %v1225_v21 = vadd.f32 %v1224_v17, %v2890_v62  ;;  %v1574_v22 = vadd.f32 %v1573_v18, %v2893_v63 }
 0x24a   :  { %v1681_v23 = vmul.f32 %v2898_v7, %v1279_v13  ;;  %v1797_v39 = vmul.f32 %v2901_v40, %v1628_v14  ;;  %v1630_v24 = vmax.f32 %v1572_v15, 0.0  ;;  %v1281_v42 = vmax.f32 %v1223_v16, 0.0  ;;  %1714 = vadd.xlane.f32.xlu0 %v1713_v61 }
 0x24b   :  { %v1682_v25 = vmul.f32 %v2906_v11, %v1280_v19  ;;  %v1798_v26 = vmul.f32 %v2909_v12, %v1629_v20  ;;  %v1282_v27 = vmax.f32 %v1225_v21, 0.0  ;;  %v1631_v28 = vmax.f32 %v1574_v22, 0.0  ;;  %1833 = vadd.xlane.f32.xlu1 %v1832_v9 }
 0x24c   :  { %v1799_v29 = vmul.f32 %v2901_v40, %v1630_v24  ;;  %v1683_v30 = vmul.f32 %v2898_v7, %v1281_v42 }
 0x24d   :  { %v1684_v31 = vmul.f32 %v2906_v11, %v1282_v27  ;;  %v1800_v32 = vmul.f32 %v2909_v12, %v1631_v28  ;;  %v1228_v6 = vpop.f32.mrb[48].mxu0  ;;  %v1577_v33 = vpop.f32.mrb[48].mxu1  ;;  %v1835_v34 = vadd.f32 %v1798_v26, %v1797_v39  ;;  %v1719_v35 = vadd.f32 %v1682_v25, %v1681_v23 }
 0x24e   :  { %1717 = vadd.xlane.f32.xlu0 %v1716_v10  ;;  %v1229_v36 = vadd.f32 %v1228_v6, %v2878_v56  ;;  %v1578_v41 = vadd.f32 %v1577_v33, %v2881_v57  ;;  %v1230_v48 = vpop.f32.mrb[49].mxu0  ;;  %v1579_v49 = vpop.f32.mrb[49].mxu1 }
 0x24f   :  { %v1231_v50 = vadd.f32 %v1230_v48, %v2890_v62  ;;  %v1580_v51 = vadd.f32 %v1579_v49, %v2893_v63  ;;  %v1581_v52 = vpop.f32.mrb[50].mxu1  ;;  %1836 = vadd.xlane.f32.xlu1 %v1835_v34  ;;  %v1232_v44 = vpop.f32.mrb[50].mxu0  ;;  %v1838_v53 = vadd.f32 %v1800_v32, %v1799_v29  ;;  %v1722_v45 = vadd.f32 %v1684_v31, %v1683_v30 }
 0x250   :  { %v1283_v46 = vmax.f32 %v1229_v36, 0.0  ;;  %v1632_v47 = vmax.f32 %v1578_v41, 0.0  ;;  %v1582_v54 = vadd.f32 %v1581_v52, %v2881_v57  ;;  %v1233_v55 = vadd.f32 %v1232_v44, %v2878_v56  ;;  %v1234_v58 = vpop.f32.mrb[51].mxu0  ;;  %v1583_v59 = vpop.f32.mrb[51].mxu1 }
 0x251   :  { %v1284_v60 = vmax.f32 %v1231_v50, 0.0  ;;  %v1633_v61 = vmax.f32 %v1580_v51, 0.0  ;;  %v1235_v0 = vadd.f32 %v1234_v58, %v2890_v62  ;;  %v1584_v1 = vadd.f32 %v1583_v59, %v2893_v63 }
 0x252   :  { %v1685_v2 = vmul.f32 %v2898_v7, %v1283_v46  ;;  %v1801_v3 = vmul.f32 %v2901_v40, %v1632_v47  ;;  %v1634_v4 = vmax.f32 %v1582_v54, 0.0  ;;  %v1285_v5 = vmax.f32 %v1233_v55, 0.0  ;;  %1720 = vadd.xlane.f32.xlu0 %v1719_v35 }
 0x253   :  { %v1686_v43 = vmul.f32 %v2906_v11, %v1284_v60  ;;  %v1802_v8 = vmul.f32 %v2909_v12, %v1633_v61  ;;  %v1286_v9 = vmax.f32 %v1235_v0, 0.0  ;;  %v1635_v10 = vmax.f32 %v1584_v1, 0.0  ;;  %1839 = vadd.xlane.f32.xlu1 %v1838_v53 }
 0x254   :  { %v1803_v13 = vmul.f32 %v2901_v40, %v1634_v4  ;;  %v1687_v14 = vmul.f32 %v2898_v7, %v1285_v5 }
 0x255   :  { %v1688_v15 = vmul.f32 %v2906_v11, %v1286_v9  ;;  %v1804_v16 = vmul.f32 %v2909_v12, %v1635_v10  ;;  %v1238_v17 = vpop.f32.mrb[52].mxu0  ;;  %v1587_v18 = vpop.f32.mrb[52].mxu1  ;;  %v1841_v19 = vadd.f32 %v1802_v8, %v1801_v3  ;;  %v1725_v20 = vadd.f32 %v1686_v43, %v1685_v2 }
 0x256   :  { %1723 = vadd.xlane.f32.xlu0 %v1722_v45  ;;  %v1239_v21 = vadd.f32 %v1238_v17, %v2878_v56  ;;  %v1588_v22 = vadd.f32 %v1587_v18, %v2881_v57  ;;  %v1240_v23 = vpop.f32.mrb[53].mxu0  ;;  %v1589_v39 = vpop.f32.mrb[53].mxu1 }
 0x257   :  { %v1241_v24 = vadd.f32 %v1240_v23, %v2890_v62  ;;  %v1590_v42 = vadd.f32 %v1589_v39, %v2893_v63  ;;  %v1591_v25 = vpop.f32.mrb[54].mxu1  ;;  %1842 = vadd.xlane.f32.xlu1 %v1841_v19  ;;  %v1242_v26 = vpop.f32.mrb[54].mxu0  ;;  %v1844_v27 = vadd.f32 %v1804_v16, %v1803_v13  ;;  %v1728_v28 = vadd.f32 %v1688_v15, %v1687_v14 }
 0x258   :  { %v1287_v29 = vmax.f32 %v1239_v21, 0.0  ;;  %v1636_v30 = vmax.f32 %v1588_v22, 0.0  ;;  %v1592_v31 = vadd.f32 %v1591_v25, %v2881_v57  ;;  %v1243_v32 = vadd.f32 %v1242_v26, %v2878_v56  ;;  %v1244_v6 = vpop.f32.mrb[55].mxu0  ;;  %v1593_v33 = vpop.f32.mrb[55].mxu1 }
 0x259   :  { %v1288_v34 = vmax.f32 %v1241_v24, 0.0  ;;  %v1637_v35 = vmax.f32 %v1590_v42, 0.0  ;;  %v1245_v36 = vadd.f32 %v1244_v6, %v2890_v62  ;;  %v1594_v41 = vadd.f32 %v1593_v33, %v2893_v63 }
 0x25a   :  { %v1689_v48 = vmul.f32 %v2898_v7, %v1287_v29  ;;  %v1805_v49 = vmul.f32 %v2901_v40, %v1636_v30  ;;  %v1638_v50 = vmax.f32 %v1592_v31, 0.0  ;;  %v1289_v51 = vmax.f32 %v1243_v32, 0.0  ;;  %1726 = vadd.xlane.f32.xlu0 %v1725_v20 }
 0x25b   :  { %v1690_v52 = vmul.f32 %v2906_v11, %v1288_v34  ;;  %v1806_v44 = vmul.f32 %v2909_v12, %v1637_v35  ;;  %v1290_v53 = vmax.f32 %v1245_v36, 0.0  ;;  %v1639_v45 = vmax.f32 %v1594_v41, 0.0  ;;  %1845 = vadd.xlane.f32.xlu1 %v1844_v27 }
 0x25c   :  { %v1807_v46 = vmul.f32 %v2901_v40, %v1638_v50  ;;  %v1691_v47 = vmul.f32 %v2898_v7, %v1289_v51 }
 0x25d   :  { %v1692_v54 = vmul.f32 %v2906_v11, %v1290_v53  ;;  %v1808_v55 = vmul.f32 %v2909_v12, %v1639_v45  ;;  %v1248_v58 = vpop.f32.mrb[56].mxu0  ;;  %v1597_v59 = vpop.f32.mrb[56].mxu1  ;;  %v1847_v60 = vadd.f32 %v1806_v44, %v1805_v49  ;;  %v1731_v61 = vadd.f32 %v1690_v52, %v1689_v48 }
 0x25e   :  { %1729 = vadd.xlane.f32.xlu0 %v1728_v28  ;;  %v1249_v0 = vadd.f32 %v1248_v58, %v2878_v56  ;;  %v1598_v1 = vadd.f32 %v1597_v59, %v2881_v57  ;;  %v1250_v2 = vpop.f32.mrb[57].mxu0  ;;  %v1599_v3 = vpop.f32.mrb[57].mxu1 }
 0x25f   :  { %v1251_v4 = vadd.f32 %v1250_v2, %v2890_v62  ;;  %v1600_v5 = vadd.f32 %v1599_v3, %v2893_v63  ;;  %v1601_v43 = vpop.f32.mrb[58].mxu1  ;;  %1848 = vadd.xlane.f32.xlu1 %v1847_v60  ;;  %v1252_v8 = vpop.f32.mrb[58].mxu0  ;;  %v1850_v9 = vadd.f32 %v1808_v55, %v1807_v46  ;;  %v1734_v10 = vadd.f32 %v1692_v54, %v1691_v47 }
 0x260   :  { %v1291_v13 = vmax.f32 %v1249_v0, 0.0  ;;  %v1640_v14 = vmax.f32 %v1598_v1, 0.0  ;;  %v1602_v15 = vadd.f32 %v1601_v43, %v2881_v57  ;;  %v1253_v16 = vadd.f32 %v1252_v8, %v2878_v56  ;;  %v1254_v17 = vpop.f32.mrb[59].mxu0  ;;  %v1603_v18 = vpop.f32.mrb[59].mxu1 }
 0x261   :  { %v1292_v19 = vmax.f32 %v1251_v4, 0.0  ;;  %v1641_v20 = vmax.f32 %v1600_v5, 0.0  ;;  %v1255_v21 = vadd.f32 %v1254_v17, %v2890_v62  ;;  %v1604_v22 = vadd.f32 %v1603_v18, %v2893_v63 }
 0x262   :  { %v1693_v23 = vmul.f32 %v2898_v7, %v1291_v13  ;;  %v1809_v39 = vmul.f32 %v2901_v40, %v1640_v14  ;;  %v1642_v24 = vmax.f32 %v1602_v15, 0.0  ;;  %v1293_v42 = vmax.f32 %v1253_v16, 0.0  ;;  %1732 = vadd.xlane.f32.xlu0 %v1731_v61 }
 0x263   :  { %v1694_v25 = vmul.f32 %v2906_v11, %v1292_v19  ;;  %v1810_v26 = vmul.f32 %v2909_v12, %v1641_v20  ;;  %v1294_v27 = vmax.f32 %v1255_v21, 0.0  ;;  %v1643_v28 = vmax.f32 %v1604_v22, 0.0  ;;  %1851 = vadd.xlane.f32.xlu1 %v1850_v9 }
 0x264   :  { %v1811_v29 = vmul.f32 %v2901_v40, %v1642_v24  ;;  %v1695_v30 = vmul.f32 %v2898_v7, %v1293_v42 }
 0x265   :  { %v1696_v31 = vmul.f32 %v2906_v11, %v1294_v27  ;;  %v1812_v32 = vmul.f32 %v2909_v12, %v1643_v28  ;;  %v1258_v6 = vpop.f32.mrb[60].mxu0  ;;  %v1607_v33 = vpop.f32.mrb[60].mxu1  ;;  %v1853_v34 = vadd.f32 %v1810_v26, %v1809_v39  ;;  %v1737_v35 = vadd.f32 %v1694_v25, %v1693_v23 }
 0x266   :  { %1735 = vadd.xlane.f32.xlu0 %v1734_v10  ;;  %v1259_v36 = vadd.f32 %v1258_v6, %v2878_v56  ;;  %v1608_v41 = vadd.f32 %v1607_v33, %v2881_v57  ;;  %v1260_v48 = vpop.f32.mrb[61].mxu0  ;;  %v1609_v49 = vpop.f32.mrb[61].mxu1  ;;  %v1900_v26 = vand.u32 127, %v770_v37  ;;  %v3059_v37 = vstv %s1749_s8 }
 0x267   :  { %v1261_v50 = vadd.f32 %v1260_v48, %v2890_v62  ;;  %v1610_v51 = vadd.f32 %v1609_v49, %v2893_v63  ;;  %1854 = vadd.xlane.f32.xlu1 %v1853_v34  ;;  %v1611_v52 = vpop.f32.mrb[62].mxu1  ;;  %v1262_v44 = vpop.f32.mrb[62].mxu0  ;;  %v1856_v53 = vadd.f32 %v1812_v32, %v1811_v29  ;;  %v1740_v45 = vadd.f32 %v1696_v31, %v1695_v30 }
 0x268   :  { %v1295_v46 = vmax.f32 %v1259_v36, 0.0  ;;  %v1644_v47 = vmax.f32 %v1608_v41, 0.0  ;;  %v1612_v54 = vadd.f32 %v1611_v52, %v2881_v57  ;;  %v1263_v55 = vadd.f32 %v1262_v44, %v2878_v56  ;;  %v1264_v58 = vpop.f32.mrb[63].mxu0  ;;  %v1613_v59 = vpop.f32.mrb[63].mxu1 }
 0x269   :  { %v1296_v60 = vmax.f32 %v1261_v50, 0.0  ;;  %v1645_v61 = vmax.f32 %v1610_v51, 0.0  ;;  %v1265_v0 = vadd.f32 %v1264_v58, %v2890_v62  ;;  %v1614_v1 = vadd.f32 %v1613_v59, %v2893_v63 }
 0x26a   :  { %v1697_v2 = vmul.f32 %v2898_v7, %v1295_v46  ;;  %v1813_v3 = vmul.f32 %v2901_v40, %v1644_v47  ;;  %v1646_v4 = vmax.f32 %v1612_v54, 0.0  ;;  %1738 = vadd.xlane.f32.xlu0 %v1737_v35  ;;  %v1297_v5 = vmax.f32 %v1263_v55, 0.0 }
 0x26b   :  { %v1698_v43 = vmul.f32 %v2906_v11, %v1296_v60  ;;  %v1814_v57 = vmul.f32 %v2909_v12, %v1645_v61  ;;  %v1298_v56 = vmax.f32 %v1265_v0, 0.0  ;;  %v1647_v8 = vmax.f32 %v1614_v1, 0.0  ;;  %1857 = vadd.xlane.f32.xlu1 %v1856_v53 }
 0x26c   :  { %v1815_v9 = vmul.f32 %v2901_v40, %v1646_v4  ;;  %v1699_v62 = vmul.f32 %v2898_v7, %v1297_v5  ;;  %v1905_v29 = vadd.s32 4294967288, %v1900_v26  ;;  %v1912_v30 = vadd.s32 4294967280, %v1900_v26 }
 0x26d   :  { %v1700_v63 = vmul.f32 %v2906_v11, %v1298_v56  ;;  %v1816_v10 = vmul.f32 %v2909_v12, %v1647_v8  ;;  %v1859_v13 = vadd.f32 %v1814_v57, %v1813_v3  ;;  %v1743_v14 = vadd.f32 %v1698_v43, %v1697_v2 }
 0x26e   :  { %1741 = vadd.xlane.f32.xlu0 %v1740_v45  ;;  %v1919_v31 = vadd.s32 4294967272, %v1900_v26  ;;  %v1926_v32 = vadd.s32 4294967264, %v1900_v26  ;;  %v1933_v6 = vadd.s32 4294967256, %v1900_v26  ;;  %v1940_v33 = vadd.s32 4294967248, %v1900_v26 }
 0x26f   :  { %1860 = vadd.xlane.f32.xlu1 %v1859_v13  ;;  %v1862_v15 = vadd.f32 %v1816_v10, %v1815_v9  ;;  %v1746_v16 = vadd.f32 %v1700_v63, %v1699_v62  ;;  %v1947_v34 = vadd.s32 4294967240, %v1900_v26  ;;  %v1954_v35 = vadd.s32 4294967232, %v1900_v26 }
 0x270   :  { %v3054_v41 = vstv %s2254_s6  ;;  %v3057_v48 = vsub.s32 %v1900_v26, %v2777_v38  ;;  %v1961_v49 = vadd.s32 4294967224, %v1900_v26  ;;  %v3064_v51 = vsub.s32 %v1905_v29, %v2777_v38 }
 0x271   :  { %v1968_v52 = vadd.s32 4294967216, %v1900_v26  ;;  %v1975_v44 = vadd.s32 4294967208, %v1900_v26  ;;  %v3067_v53 = vsub.s32 %v1912_v30, %v2777_v38  ;;  %v3070_v45 = vsub.s32 %v1919_v31, %v2777_v38 }
 0x272   :  { %1744 = vadd.xlane.f32.xlu0 %v1743_v14  ;;  %v3073_v46 = vsub.s32 %v1926_v32, %v2777_v38  ;;  %v1982_v47 = vadd.s32 4294967200, %v1900_v26  ;;  %v3076_v54 = vsub.s32 %v1933_v6, %v2777_v38  ;;  %v3079_v55 = vsub.s32 %v1940_v33, %v2777_v38 }
 0x273   :  { %1863 = vadd.xlane.f32.xlu1 %v1862_v15  ;;  %v3082_v58 = vsub.s32 %v1947_v34, %v2777_v38  ;;  %v3085_v59 = vsub.s32 %v1954_v35, %v2777_v38  ;;  %v3091_v0 = vsub.s32 %v1961_v49, %v2777_v38  ;;  %v1989_v2 = vadd.s32 4294967192, %v1900_v26 }
 0x274   :  { %v1996_v3 = vadd.s32 4294967184, %v1900_v26  ;;  %v3098_v43 = vsub.s32 %v1968_v52, %v2777_v38  ;;  %v3101_v57 = vsub.s32 %v1975_v44, %v2777_v38  ;;  %v3107_v62 = vsub.s32 %v1982_v47, %v2777_v38 }
 0x275   :  { %v2003_v15 = vadd.s32 4294967176, %v1900_v26 }
 0x276   :  { %1747 = vadd.xlane.f32.xlu0 %v1746_v16 }
 0x2c4   :  { %v1819_v17 = vpop.xlane.xlu1 %1818  ;;  %v3035_v18 = vpop.xlane.xlu0 %1702 }
 0x2c5   :  { %v1867_v56 = vadd.f32 %v3054_v41, %v1819_v17  ;;  %v1751_v63 = vadd.f32 %v3059_v37, %v3035_v18 }
 0x2c7   :  { %v1904_v30 = vrot.slane %v1751_v63, %v3057_v48 }
 0x2c8   :  { %v1822_v19 = vpop.xlane.xlu1 %1821 }
 0x2c9   :  { %v1868_v61 = vadd.f32 %v3054_v41, %v1822_v19 }
 0x2cb   :  { %v1706_v40 = vpop.xlane.xlu0 %1705  ;;  %v2035_v16 = vrot.slane %v1868_v61, %v3064_v51 }
 0x2cc   :  { %v1825_v20 = vpop.xlane.xlu1 %1824  ;;  %v1752_v4 = vadd.f32 %v3059_v37, %v1706_v40  ;;  %v3116_v40 = vsub.s32 %v1989_v2, %v2777_v38 }
 0x2cd   :  { %v1869_v5 = vadd.f32 %v3054_v41, %v1825_v20  ;;  %v3119_v20 = vsub.s32 %v1996_v3, %v2777_v38 }
 0x2ce   :  { %v1909_v18 = vrot.slane %v1752_v4, %v3064_v51 }
 0x2cf   :  { %v1709_v7 = vpop.xlane.xlu0 %1708 }
 0x2d0   :  { %v1828_v21 = vpop.xlane.xlu1 %1827  ;;  %v1753_v8 = vadd.f32 %v3059_v37, %v1709_v7  ;;  %v2040_v7 = vrot.slane %v1869_v5, %v3067_v53 }
 0x2d1   :  { %v1870_v9 = vadd.f32 %v3054_v41, %v1828_v21 }
 0x2d3   :  { %v1712_v11 = vpop.xlane.xlu0 %1711  ;;  %v2045_v26 = vrot.slane %v1870_v9, %v3070_v45 }
 0x2d4   :  { %v1831_v22 = vpop.xlane.xlu1 %1830  ;;  %v1754_v10 = vadd.f32 %v3059_v37, %v1712_v11 }
 0x2d5   :  { %v1871_v13 = vadd.f32 %v3054_v41, %v1831_v22  ;;  %v2031_v22 = vrot.slane %v1867_v56, %v3057_v48  ;;  %v1911_v48 = vsel %vm1910_vm3, %v1909_v18, %v1904_v30 }
 0x2d6   :  { %v1923_v31 = vrot.slane %v1754_v10, %v3070_v45 }
 0x2d7   :  { %v1715_v12 = vpop.xlane.xlu0 %1714  ;;  %v2050_v32 = vrot.slane %v1871_v13, %v3073_v46  ;;  %v2036_v6 = vsel %vm1910_vm3, %v2035_v16, %v2031_v22 }
 0x2d8   :  { %v3037_v23 = vpop.xlane.xlu1 %1833  ;;  %v1755_v17 = vadd.f32 %v3059_v37, %v1715_v12  ;;  %v1916_v12 = vrot.slane %v1753_v8, %v3067_v53  ;;  %v2041_v49 = vsel %vm1917_vm4, %v2040_v7, %v2036_v6 }
 0x2d9   :  { %v1872_v21 = vadd.f32 %v3054_v41, %v3037_v23  ;;  %v2046_v44 = vsel %vm1924_vm5, %v2045_v26, %v2041_v49 }
 0x2da   :  { %v1930_v33 = vrot.slane %v1755_v17, %v3073_v46  ;;  %v1918_v52 = vsel %vm1917_vm4, %v1916_v12, %v1911_v48  ;;  %v2051_v45 = vsel %vm1931_vm6, %v2050_v32, %v2046_v44 }
 0x2db   :  { %v3039_v39 = vpop.xlane.xlu0 %1717  ;;  %v2055_v51 = vrot.slane %v1872_v21, %v3076_v54  ;;  %v1925_v53 = vsel %vm1924_vm5, %v1923_v31, %v1918_v52 }
 0x2dc   :  { %v3041_v24 = vpop.xlane.xlu1 %1836  ;;  %v1756_v11 = vadd.f32 %v3059_v37, %v3039_v39  ;;  %v3136_v39 = vsub.s32 %v2003_v15, %v2777_v38  ;;  %v1932_v61 = vsel %vm1931_vm6, %v1930_v33, %v1925_v53 }
 0x2dd   :  { %v1873_v29 = vadd.f32 %v3054_v41, %v3041_v24  ;;  %v2056_v5 = vsel %vm1938_vm7, %v2055_v51, %v2051_v45 }
 0x2de   :  { %v1937_v38 = vrot.slane %v1756_v11, %v3076_v54 }
 0x2df   :  { %v3043_v42 = vpop.xlane.xlu0 %1720 }
 0x2e0   :  { %v3045_v25 = vpop.xlane.xlu1 %1839  ;;  %v1757_v34 = vadd.f32 %v3059_v37, %v3043_v42  ;;  %v2060_v42 = vrot.slane %v1873_v29, %v3079_v55 }
 0x2e1   :  { %v1874_v24 = vadd.f32 %v3054_v41, %v3045_v25 }
 0x2e2   :  { %v1944_v2 = vrot.slane %v1757_v34, %v3079_v55  ;;  %v2061_v8 = vsel %vm1945_vm8, %v2060_v42, %v2056_v5 }
 0x2e3   :  { %v3048_v27 = vpop.xlane.xlu0 %1723  ;;  %v2065_v3 = vrot.slane %v1874_v24, %v3082_v58 }
 0x2e4   :  { %v3050_v28 = vpop.xlane.xlu1 %1842  ;;  %v1758_v46 = vadd.f32 %v3059_v37, %v3048_v27  ;;  %v1939_v27 = vsel %vm1938_vm7, %v1937_v38, %v1932_v61 }
 0x2e5   :  { %v1875_v25 = vadd.f32 %v3054_v41, %v3050_v28  ;;  %v1946_v16 = vsel %vm1945_vm8, %v1944_v2, %v1939_v27  ;;  %v2066_v17 = vsel %vm1952_vm9, %v2065_v3, %v2061_v8 }
 0x2e6   :  { %v1951_v63 = vrot.slane %v1758_v46, %v3082_v58 }
 0x2e7   :  { %v3052_v36 = vpop.xlane.xlu0 %1726  ;;  %v2070_v55 = vrot.slane %v1875_v25, %v3085_v59 }
 0x2e8   :  { %v3061_v50 = vpop.xlane.xlu1 %1845  ;;  %v1953_v29 = vsel %vm1952_vm9, %v1951_v63, %v1946_v16 }
 0x2e9   :  { %v1876_v47 = vadd.f32 %v3054_v41, %v3061_v50  ;;  %v1759_v50 = vadd.f32 %v3059_v37, %v3052_v36  ;;  %v2071_v11 = vsel %vm1959_vm10, %v2070_v55, %v2066_v17 }
 0x2eb   :  { %v3087_v60 = vpop.xlane.xlu0 %1729  ;;  %v2075_v10 = vrot.slane %v1876_v47, %v3091_v0  ;;  %v1958_v7 = vrot.slane %v1759_v50, %v3085_v59 }
 0x2ec   :  { %v3093_v1 = vpop.xlane.xlu1 %1848  ;;  %v1760_v9 = vadd.f32 %v3059_v37, %v3087_v60 }
 0x2ed   :  { %v1877_v28 = vadd.f32 %v3054_v41, %v3093_v1  ;;  %v2076_v30 = vsel %vm1966_vm11, %v2075_v10, %v2071_v11  ;;  %v1960_v24 = vsel %vm1959_vm10, %v1958_v7, %v1953_v29 }
 0x2ee   :  { %v1965_v22 = vrot.slane %v1760_v9, %v3091_v0 }
 0x2ef   :  { %v1733_v14 = vpop.xlane.xlu0 %1732 }
 0x2f0   :  { %v1852_v19 = vpop.xlane.xlu1 %1851  ;;  %v1761_v13 = vadd.f32 %v3059_v37, %v1733_v14  ;;  %v1967_v49 = vsel %vm1966_vm11, %v1965_v22, %v1960_v24 }
 0x2f1   :  { %v1878_v56 = vadd.f32 %v3054_v41, %v1852_v19  ;;  %v2080_v19 = vrot.slane %v1877_v28, %v3098_v43 }
 0x2f2   :  { %v1972_v59 = vrot.slane %v1761_v13, %v3098_v43 }
 0x2f3   :  { %v1736_v23 = vpop.xlane.xlu0 %1735  ;;  %v2085_v58 = vrot.slane %v1878_v56, %v3101_v57 }
 0x2f4   :  { %v1855_v35 = vpop.xlane.xlu1 %1854  ;;  %v1762_v18 = vadd.f32 %v3059_v37, %v1736_v23  ;;  %v2081_v23 = vsel %vm1973_vm12, %v2080_v19, %v2076_v30 }
 0x2f5   :  { %v1879_v1 = vadd.f32 %v3054_v41, %v1855_v35  ;;  %v2086_v35 = vsel %vm1980_vm13, %v2085_v58, %v2081_v23 }
 0x2f6   :  { %v1979_v6 = vrot.slane %v1762_v18, %v3101_v57  ;;  %v1974_v57 = vsel %vm1973_vm12, %v1972_v59, %v1967_v49 }
 0x2f7   :  { %v1739_v54 = vpop.xlane.xlu0 %1738  ;;  %v2090_v12 = vrot.slane %v1879_v1, %v3107_v62 }
 0x2f8   :  { %v1858_v4 = vpop.xlane.xlu1 %1857  ;;  %v1763_v21 = vadd.f32 %v3059_v37, %v1739_v54 }
 0x2f9   :  { %v1880_v36 = vadd.f32 %v3054_v41, %v1858_v4  ;;  %v2091_v51 = vsel %vm1987_vm14, %v2090_v12, %v2086_v35 }
 0x2fa   :  { %v1986_v48 = vrot.slane %v1763_v21, %v3107_v62  ;;  %v1981_v62 = vsel %vm1980_vm13, %v1979_v6, %v1974_v57 }
 0x2fb   :  { %v1742_v15 = vpop.xlane.xlu0 %1741  ;;  %v2095_v31 = vrot.slane %v1880_v36, %v3116_v40 }
 0x2fc   :  { %v1861_v60 = vpop.xlane.xlu1 %1860  ;;  %v1764_v26 = vadd.f32 %v3059_v37, %v1742_v15 }
 0x2fd   :  { %v1881_v14 = vadd.f32 %v3054_v41, %v1861_v60  ;;  %v2096_v25 = vsel %vm1994_vm15, %v2095_v31, %v2091_v51 }
 0x2fe   :  { %v1993_v38 = vrot.slane %v1764_v26, %v3116_v40  ;;  %v1988_v40 = vsel %vm1987_vm14, %v1986_v48, %v1981_v62 }
 0x2ff   :  { %v1745_v32 = vpop.xlane.xlu0 %1744  ;;  %v2100_v33 = vrot.slane %v1881_v14, %v3119_v20 }
 0x300   :  { %v1765_v0 = vadd.f32 %v3059_v37, %v1745_v32  ;;  %v1864_v34 = vpop.xlane.xlu1 %1863 }
 0x301   :  { %v1882_v43 = vadd.f32 %v3054_v41, %v1864_v34  ;;  %v2101_v53 = vsel %vm2001_vm0, %v2100_v33, %v2096_v25 }
 0x302   :  { %v2000_v52 = vrot.slane %v1765_v0, %v3119_v20  ;;  %v1995_v20 = vsel %vm1994_vm15, %v1993_v38, %v1988_v40 }
 0x303   :  { %v2105_v44 = vrot.slane %v1882_v43, %v3136_v39  ;;  %v1748_v42 = vpop.xlane.xlu0 %1747 }
 0x304   :  { %v1766_v41 = vadd.f32 %v3059_v37, %v1748_v42  ;;  %v2002_v47 = vsel %vm2001_vm0, %v2000_v52, %v1995_v20 }
 0x305   :  { %v2106_v45 = vsel %vm2008_vm1, %v2105_v44, %v2101_v53 }
 0x306   :  { %v2007_v46 = vrot.slane %v1766_v41, %v3136_v39  ;;  %2108 = vst [vmem:[#allocation9 + $0x1] sm:$0x1] %v2106_v45 }
 0x308   :  { %v2009_v54 = vsel %vm2008_vm1, %v2007_v46, %v2002_v47 }
 0x309   :  { %2011 = vst [vmem:[#allocation9] sm:$0x1] %v2009_v54 }
 0x30a   :  { %2519 = shalt.err (!%p2516_p11)
}
 0x30b   :  { %s2520_s3 = scalar_lea.hbm %s3241_s11, 32 }
 0x30c   :  { %p2521_p12 = scmp.ne.s32.totalorder %s3241_s11, %s2520_s3  ;;  %p2524_p13 = scmp.lt.u32.totalorder %s2520_s3, %s3241_s11 }
 0x30e   :  { %p2526_p0 = pnand %p2524_p13, %p2521_p12 }
 0x310   :  { %2529 = shalt.err (!%p2526_p0)
}
 0x311   :  { %2118 = dma.vmem_to_hbm [thread:$0]  %s2116_s12, 32, %s3241_s11, [#allocation4]  }
 0x312   :  { %2536 = dma.done.wait [#allocation4], 32  }
 0x313   :  { %2537 = vsyncadd [#allocation4], 4294967264 }
 0x314   :  { %2122 = vsyncpa [#allocation3], 1 }
 0x315   :  { %2123 = vsyncpa [#allocation7], 1 }
 0x316   :  { %2124 = vsyncpa [#allocation4], 1 }
 0x317   :  { %2125 = vsyncpa [#allocation5], 1 }

</bundles_post_ra>
